<compile_context>
chip_gen: v7x
topology: tpu7x:2x2x1
jax: 0.10.0
libtpu: 0.0.40
codegen_flags: <defaults>
</compile_context>

<pallas_src>
import functools

import jax
import jax.numpy as jnp
from jax.experimental import pallas as pl
from jax.experimental.pallas import tpu as pltpu

EPS = 1e-5                       # nn.BatchNorm2d default
VMEM_LIMIT = 32 * 1024 * 1024    # explicit scoped-VMEM budget (safe on v5e/v6e/v7x)


# ----------------------------------------------------------------------------
# Stage-1 kernel: conv1 + shortcut as one matmul per M-tile, + BN partials
# ----------------------------------------------------------------------------
def _conv1_short_stats_kernel(p1_ref, wc_ref, cb_ref, ys_ref, stats_ref):
    """One M-tile: [y1 | short] = p1 @ [w1 | ws] + [0 | bs], plus per-tile
    partial BN statistics (sum, sum-of-squares) over the y1 half."""
    cout = wc_ref.shape[1] // 2
    ys = jnp.dot(p1_ref[...], wc_ref[...],
                 preferred_element_type=jnp.float32) + cb_ref[...]
    ys_ref[...] = ys
    y1 = ys[:, :cout]
    ssum = jnp.sum(y1, axis=0, keepdims=True)          # (1, Cout)
    ssq = jnp.sum(y1 * y1, axis=0, keepdims=True)      # (1, Cout)
    stats_ref[...] = jnp.concatenate([ssum, ssq], axis=0).reshape(1, 2, cout)


# ----------------------------------------------------------------------------
# Stage-2 kernel: fused BN + ReLU + conv2(3x3,s1,p1) + residual add (per image)
# ----------------------------------------------------------------------------
def _bn_relu_conv2_add_kernel(ys_ref, w2_ref, scale_ref, shift_ref, b2_ref,
                              out_ref, *, ho, wo, cout):
    """z = ReLU(scale*y1 + shift); out = short + b2 + conv3x3(z).
    conv2 is 9 shifted (M_img, C) @ (C, C) matmul-accumulates on the
    VMEM-resident z (no p2 im2col materialisation in HBM)."""
    m_img = ho * wo
    ys = ys_ref[...]                    # (M_img, 2*Cout) = [y1 | short]
    y1 = ys[:, :cout]
    short = ys[:, cout:]
    z = jnp.maximum(y1 * scale_ref[...] + shift_ref[...], 0.0)

    # Flattened-row zero padding: row (r + d) of the image, with rows outside
    # [0, M_img) reading as 0.  pad covers the largest |shift| = wo + 1.
    pad = wo + 1
    zeros = jnp.zeros((pad, cout), jnp.float32)
    zpad = jnp.concatenate([zeros, z, zeros], axis=0)   # (M_img + 2*pad, Cout)

    # Column-validity masks for horizontal taps (dw = -1 / +1).
    woi = jax.lax.broadcasted_iota(jnp.int32, (m_img, 1), 0) % wo
    left_ok = woi >= 1
    right_ok = woi < (wo - 1)

    acc = short + b2_ref[...]
    for kh in range(3):
        for kw in range(3):
            dh, dw = kh - 1, kw - 1
            d = dh * wo + dw
            zs = zpad[pad + d:pad + d + m_img, :]       # z shifted by (dh, dw)
            if dw == -1:
                zs = jnp.where(left_ok, zs, 0.0)
            elif dw == 1:
                zs = jnp.where(right_ok, zs, 0.0)
            t = kh * 3 + kw
            acc = acc + jnp.dot(zs, w2_ref[t * cout:(t + 1) * cout, :],
                                preferred_element_type=jnp.float32)
    out_ref[...] = acc


# ----------------------------------------------------------------------------
# JAX glue: im2col for conv1 (pure data movement)
# ----------------------------------------------------------------------------
def _im2col(x_nhwc, ksize, stride, pad):
    n, h, w, c = x_nhwc.shape
    xp = jnp.pad(x_nhwc, ((0, 0), (pad, pad), (pad, pad), (0, 0)))
    ho = (h + 2 * pad - ksize) // stride + 1
    wo = (w + 2 * pad - ksize) // stride + 1
    cols = []
    for kh in range(ksize):
        for kw in range(ksize):
            patch = xp[:, kh:kh + stride * ho:stride,
                       kw:kw + stride * wo:stride, :]
            cols.append(patch.reshape(n * ho * wo, c))
    return jnp.concatenate(cols, axis=1), ho, wo       # (N*Ho*Wo, k*k*C)


# ----------------------------------------------------------------------------
# Forward wrapper
# ----------------------------------------------------------------------------
@functools.partial(jax.jit, static_argnames=("stride", "tm"))
def residual_block_forward(x_nchw, params, stride=2, tm=512):
    w1, b1, w2, b2, ws, bs, gamma, beta = params
    # b1 is intentionally unused: a per-channel constant bias cancels exactly
    # under batch-statistics BatchNorm (kept in params for API parity).
    del b1
    x = jnp.transpose(x_nchw, (0, 2, 3, 1)).astype(jnp.float32)  # NCHW -> NHWC
    n, h, w, cin = x.shape
    cout = w1.shape[-1]

    # ---- stage 1 prep ----
    p1, ho, wo = _im2col(x, 3, stride, 1)               # (M, 9*Cin)
    m = n * ho * wo
    m_img = ho * wo

    tm = min(tm, -(-m // 8) * 8)                        # clamp; keep multiple of 8
    num_tiles = pl.cdiv(m, tm)
    m_pad = num_tiles * tm
    if m_pad != m:
        # zero rows contribute exactly 0 to the BN partials (no conv1 bias)
        p1 = jnp.pad(p1, ((0, m_pad - m), (0, 0)))

    # Combined weight [w1 | ws@center-tap] and bias [0 | bs].
    w1m = w1.reshape(9 * cin, cout)                     # rows ordered (kh,kw,ci)
    wsm = jnp.zeros((9 * cin, cout), jnp.float32)
    wsm = wsm.at[4 * cin:5 * cin, :].set(ws.reshape(cin, cout))
    wc = jnp.concatenate([w1m, wsm], axis=1)            # (9*Cin, 2*Cout)
    cb = jnp.concatenate([jnp.zeros((1, cout), jnp.float32),
                          bs.reshape(1, cout)], axis=1)

    # TODO(synk): cast MXU operands to bf16 on v6e/v7x once the 1e-3 tolerance
    # is re-validated on hardware.
    ys, stats = pl.pallas_call(
        _conv1_short_stats_kernel,
        grid=(num_tiles,),
        in_specs=[pl.BlockSpec((tm, 9 * cin), lambda i: (i, 0)),
                  pl.BlockSpec((9 * cin, 2 * cout), lambda i: (0, 0)),
                  pl.BlockSpec((1, 2 * cout), lambda i: (0, 0))],
        out_specs=[pl.BlockSpec((tm, 2 * cout), lambda i: (i, 0)),
                   pl.BlockSpec((1, 2, cout), lambda i: (i, 0, 0))],
        out_shape=(jax.ShapeDtypeStruct((m_pad, 2 * cout), jnp.float32),
                   jax.ShapeDtypeStruct((num_tiles, 2, cout), jnp.float32)),
        compiler_params=pltpu.CompilerParams(
            dimension_semantics=("parallel",),
            vmem_limit_bytes=VMEM_LIMIT),
    )(p1, wc, cb)

    # ---- BN finalize (tiny): batch mean / biased variance from partials ----
    tot = jnp.sum(stats, axis=0)                        # (2, Cout)
    mean = tot[0] / m
    var = tot[1] / m - mean * mean                      # E[x^2] - E[x]^2
    inv = jax.lax.rsqrt(var + EPS)
    scale = gamma * inv
    shift = beta - mean * scale

    # ---- stage 2: fused BN+ReLU + conv2 + residual add, one image per step ----
    ysv = ys[:m].reshape(n, m_img, 2 * cout)
    w2m = w2.reshape(9 * cout, cout)

    out = pl.pallas_call(
        functools.partial(_bn_relu_conv2_add_kernel, ho=ho, wo=wo, cout=cout),
        grid=(n,),
        in_specs=[pl.BlockSpec((None, m_img, 2 * cout), lambda b: (b, 0, 0)),
                  pl.BlockSpec((9 * cout, cout), lambda b: (0, 0)),
                  pl.BlockSpec((1, cout), lambda b: (0, 0)),
                  pl.BlockSpec((1, cout), lambda b: (0, 0)),
                  pl.BlockSpec((1, cout), lambda b: (0, 0))],
        out_specs=pl.BlockSpec((None, m_img, cout), lambda b: (b, 0, 0)),
        out_shape=jax.ShapeDtypeStruct((n, m_img, cout), jnp.float32),
        compiler_params=pltpu.CompilerParams(
            dimension_semantics=("parallel",),
            vmem_limit_bytes=VMEM_LIMIT),
    )(ysv, w2m, scale.reshape(1, cout), shift.reshape(1, cout),
      b2.reshape(1, cout))
    # TODO(synk): for very large images, tile stage 2 over H with halo rows and
    # pad channels to a lane-dense multiple of 128 for real ResNet widths.

    return jnp.transpose(out.reshape(n, ho, wo, cout), (0, 3, 1, 2))  # -> NCHW


# ----------------------------------------------------------------------------
# Pure-JAX reference (lax convs) for validation
# ----------------------------------------------------------------------------
def _ref_forward(x_nchw, params, stride=2):
    w1, b1, w2, b2, ws, bs, gamma, beta = params
    x = jnp.transpose(x_nchw, (0, 2, 3, 1)).astype(jnp.float32)
    dn = ("NHWC", "HWIO", "NHWC")
    hi = jax.lax.Precision.HIGHEST
    short = jax.lax.conv_general_dilated(
        x, ws, (stride, stride), "VALID", dimension_numbers=dn, precision=hi) + bs
    y1 = jax.lax.conv_general_dilated(
        x, w1, (stride, stride), ((1, 1), (1, 1)),
        dimension_numbers=dn, precision=hi) + b1
    mean = y1.mean(axis=(0, 1, 2))
    var = ((y1 - mean) ** 2).mean(axis=(0, 1, 2))
    z = jnp.maximum(gamma * (y1 - mean) / jnp.sqrt(var + EPS) + beta, 0.0)
    y2 = jax.lax.conv_general_dilated(
        z, w2, (1, 1), ((1, 1), (1, 1)),
        dimension_numbers=dn, precision=hi) + b2
    return jnp.transpose(short + y2, (0, 3, 1, 2))


# ----------------------------------------------------------------------------
if __name__ == "__main__":
    N, CIN, COUT, H, W, STRIDE = 2, 4, 8, 16, 16, 2

    key = jax.random.PRNGKey(0)
    ks = jax.random.split(key, 9)
    # Deterministic synthetic parameters (shapes match the PyTorch module).
    w1 = 0.1 * jax.random.normal(ks[0], (3, 3, CIN, COUT), jnp.float32)   # conv1
    b1 = 0.1 * jax.random.normal(ks[1], (COUT,), jnp.float32)
    w2 = 0.1 * jax.random.normal(ks[2], (3, 3, COUT, COUT), jnp.float32)  # conv2
    b2 = 0.1 * jax.random.normal(ks[3], (COUT,), jnp.float32)
    ws = 0.1 * jax.random.normal(ks[4], (1, 1, CIN, COUT), jnp.float32)   # proj 1x1
    bs = 0.1 * jax.random.normal(ks[5], (COUT,), jnp.float32)
    gamma = 1.0 + 0.1 * jax.random.normal(ks[6], (COUT,), jnp.float32)    # BN weight
    beta = 0.1 * jax.random.normal(ks[7], (COUT,), jnp.float32)           # BN bias
    params = (w1, b1, w2, b2, ws, bs, gamma, beta)

    x = jax.random.normal(ks[8], (N, CIN, H, W), jnp.float32)             # NCHW

    # tm=64 so the test exercises a multi-tile stage-1 grid (M = 128 rows).
    out = residual_block_forward(x, params, stride=STRIDE, tm=64)
    out = jax.block_until_ready(out)

    ref = _ref_forward(x, params, stride=STRIDE)
    assert out.shape == (N, COUT, H // STRIDE, W // STRIDE), out.shape
    assert jnp.allclose(out, ref, atol=1e-3, rtol=1e-3), (
        float(jnp.max(jnp.abs(out - ref))))

    print("KERNEL_OK")
</pallas_src>

<mosaic_0001>
module attributes {stable_mosaic.version = 11 : i64} {
  func.func @_conv1_short_stats_kernel(%arg0: i32, %arg1: memref<64x36xf32, #tpu.memory_space<vmem>>, %arg2: memref<36x16xf32, #tpu.memory_space<vmem>>, %arg3: memref<1x16xf32, #tpu.memory_space<vmem>>, %arg4: memref<64x16xf32, #tpu.memory_space<vmem>>, %arg5: memref<1x2x8xf32, #tpu.memory_space<vmem>>) attributes {dimension_semantics = [#tpu.dimension_semantics<parallel>], iteration_bounds = array<i64: 2>, scalar_prefetch = 0 : i64, scratch_operands = 0 : i64, tpu.core_type = #tpu.core_type<tc>, window_params = [{transform_indices = @transform_0, window_bounds = array<i64: 64, 36>}, {pipeline_mode = #tpu.pipeline_mode<synchronous>, transform_indices = @transform_1, window_bounds = array<i64: 36, 16>}, {pipeline_mode = #tpu.pipeline_mode<synchronous>, transform_indices = @transform_2, window_bounds = array<i64: 1, 16>}, {transform_indices = @transform_3, window_bounds = array<i64: 64, 16>}, {transform_indices = @transform_4, window_bounds = array<i64: 1, 2, 8>}]} {
    %c0 = arith.constant 0 : index
    %c0_0 = arith.constant 0 : index
    %0 = vector.load %arg1[%c0, %c0_0] : memref<64x36xf32, #tpu.memory_space<vmem>>, vector<64x36xf32>
    %c0_1 = arith.constant 0 : index
    %c0_2 = arith.constant 0 : index
    %1 = vector.load %arg2[%c0_1, %c0_2] : memref<36x16xf32, #tpu.memory_space<vmem>>, vector<36x16xf32>
    %cst = arith.constant dense<0.000000e+00> : vector<64x16xf32>
    %2 = tpu.matmul %0, %1, %cst {dimension_numbers = #tpu.dot_dimension_numbers<[1], [0], [0], [1], [0, 0, 1, 1], [], []>} : vector<64x36xf32>, vector<36x16xf32>, vector<64x16xf32> -> vector<64x16xf32>
    %c0_3 = arith.constant 0 : index
    %c0_4 = arith.constant 0 : index
    %3 = vector.load %arg3[%c0_3, %c0_4] : memref<1x16xf32, #tpu.memory_space<vmem>>, vector<1x16xf32>
    %4 = vector.broadcast %3 : vector<1x16xf32> to vector<64x16xf32>
    %5 = arith.addf %2, %4 : vector<64x16xf32>
    %c0_5 = arith.constant 0 : index
    %c0_6 = arith.constant 0 : index
    %6 = vector.load %arg4[%c0_5, %c0_6] : memref<64x16xf32, #tpu.memory_space<vmem>>, vector<64x16xf32>
    tpu.vector_store %arg4[%c0_5, %c0_6], %5 {strides = array<i32>} : memref<64x16xf32, #tpu.memory_space<vmem>>, vector<64x16xf32>,
    %7 = vector.extract_strided_slice %5 {offsets = [0, 0], sizes = [64, 8], strides = [1, 1]} : vector<64x16xf32> to vector<64x8xf32>
    %cst_7 = arith.constant dense<0.000000e+00> : vector<8xf32>
    %8 = vector.multi_reduction <add>, %7, %cst_7 [0] : vector<64x8xf32> to vector<8xf32>
    %9 = vector.shape_cast %8 : vector<8xf32> to vector<1x8xf32>
    %10 = arith.mulf %7, %7 : vector<64x8xf32>
    %cst_8 = arith.constant dense<0.000000e+00> : vector<8xf32>
    %11 = vector.multi_reduction <add>, %10, %cst_8 [0] : vector<64x8xf32> to vector<8xf32>
    %12 = vector.shape_cast %11 : vector<8xf32> to vector<1x8xf32>
    %13 = tpu.concatenate %9, %12 in 0 : vector<1x8xf32>, vector<1x8xf32> -> vector<2x8xf32>
    %14 = vector.shape_cast %13 : vector<2x8xf32> to vector<1x2x8xf32>
    %c0_9 = arith.constant 0 : index
    %c0_10 = arith.constant 0 : index
    %c0_11 = arith.constant 0 : index
    %15 = vector.load %arg5[%c0_9, %c0_10, %c0_11] : memref<1x2x8xf32, #tpu.memory_space<vmem>>, vector<1x2x8xf32>
    tpu.vector_store %arg5[%c0_9, %c0_10, %c0_11], %14 {strides = array<i32>} : memref<1x2x8xf32, #tpu.memory_space<vmem>>, vector<1x2x8xf32>,
    return
  }
  func.func @transform_0(%arg0: i32) -> (i32, i32) {
    %c0_i32 = arith.constant 0 : i32
    %c0_i32_0 = arith.constant 0 : i32
    return %arg0, %c0_i32 : i32, i32
  }
  func.func @transform_1(%arg0: i32) -> (i32, i32) {
    %c0_i32 = arith.constant 0 : i32
    %c0_i32_0 = arith.constant 0 : i32
    %c0_i32_1 = arith.constant 0 : i32
    return %c0_i32, %c0_i32_0 : i32, i32
  }
  func.func @transform_2(%arg0: i32) -> (i32, i32) {
    %c0_i32 = arith.constant 0 : i32
    %c0_i32_0 = arith.constant 0 : i32
    %c0_i32_1 = arith.constant 0 : i32
    return %c0_i32, %c0_i32_0 : i32, i32
  }
  func.func @transform_3(%arg0: i32) -> (i32, i32) {
    %c0_i32 = arith.constant 0 : i32
    %c0_i32_0 = arith.constant 0 : i32
    return %arg0, %c0_i32 : i32, i32
  }
  func.func @transform_4(%arg0: i32) -> (i32, i32, i32) {
    %c0_i32 = arith.constant 0 : i32
    %c0_i32_0 = arith.constant 0 : i32
    %c0_i32_1 = arith.constant 0 : i32
    return %arg0, %c0_i32, %c0_i32_0 : i32, i32, i32
  }
}

module attributes {stable_mosaic.version = 11 : i64} {
  func.func @_bn_relu_conv2_add_kernel(%arg0: i32, %arg1: memref<1x64x16xf32, #tpu.memory_space<vmem>>, %arg2: memref<72x8xf32, #tpu.memory_space<vmem>>, %arg3: memref<1x8xf32, #tpu.memory_space<vmem>>, %arg4: memref<1x8xf32, #tpu.memory_space<vmem>>, %arg5: memref<1x8xf32, #tpu.memory_space<vmem>>, %arg6: memref<1x64x8xf32, #tpu.memory_space<vmem>>) attributes {dimension_semantics = [#tpu.dimension_semantics<parallel>], iteration_bounds = array<i64: 2>, scalar_prefetch = 0 : i64, scratch_operands = 0 : i64, tpu.core_type = #tpu.core_type<tc>, window_params = [{transform_indices = @transform_0, window_bounds = array<i64: 1, 64, 16>}, {pipeline_mode = #tpu.pipeline_mode<synchronous>, transform_indices = @transform_1, window_bounds = array<i64: 72, 8>}, {pipeline_mode = #tpu.pipeline_mode<synchronous>, transform_indices = @transform_2, window_bounds = array<i64: 1, 8>}, {pipeline_mode = #tpu.pipeline_mode<synchronous>, transform_indices = @transform_3, window_bounds = array<i64: 1, 8>}, {pipeline_mode = #tpu.pipeline_mode<synchronous>, transform_indices = @transform_4, window_bounds = array<i64: 1, 8>}, {transform_indices = @transform_5, window_bounds = array<i64: 1, 64, 8>}]} {
    %c0 = arith.constant 0 : index
    %c0_0 = arith.constant 0 : index
    %c0_1 = arith.constant 0 : index
    %0 = vector.load %arg1[%c0, %c0_0, %c0_1] : memref<1x64x16xf32, #tpu.memory_space<vmem>>, vector<1x64x16xf32>
    %1 = vector.shape_cast %0 : vector<1x64x16xf32> to vector<64x16xf32>
    %2 = vector.extract_strided_slice %1 {offsets = [0, 0], sizes = [64, 8], strides = [1, 1]} : vector<64x16xf32> to vector<64x8xf32>
    %3 = vector.extract_strided_slice %1 {offsets = [0, 8], sizes = [64, 8], strides = [1, 1]} : vector<64x16xf32> to vector<64x8xf32>
    %c0_2 = arith.constant 0 : index
    %c0_3 = arith.constant 0 : index
    %4 = vector.load %arg3[%c0_2, %c0_3] : memref<1x8xf32, #tpu.memory_space<vmem>>, vector<1x8xf32>
    %5 = vector.broadcast %4 : vector<1x8xf32> to vector<64x8xf32>
    %6 = arith.mulf %2, %5 : vector<64x8xf32>
    %c0_4 = arith.constant 0 : index
    %c0_5 = arith.constant 0 : index
    %7 = vector.load %arg4[%c0_4, %c0_5] : memref<1x8xf32, #tpu.memory_space<vmem>>, vector<1x8xf32>
    %8 = vector.broadcast %7 : vector<1x8xf32> to vector<64x8xf32>
    %9 = arith.addf %6, %8 : vector<64x8xf32>
    %cst = arith.constant 0.000000e+00 : f32
    %10 = vector.broadcast %cst : f32 to vector<64x8xf32>
    %11 = arith.maximumf %9, %10 : vector<64x8xf32>
    %cst_6 = arith.constant 0.000000e+00 : f32
    %12 = vector.broadcast %cst_6 : f32 to vector<9x8xf32>
    %13 = tpu.concatenate %12, %11, %12 in 0 : vector<9x8xf32>, vector<64x8xf32>, vector<9x8xf32> -> vector<82x8xf32>
    %14 = tpu.iota {dimensions = array<i32: 0>} : vector<64x1xi32>
    %c8_i32 = arith.constant 8 : i32
    %c0_i32 = arith.constant 0 : i32
    %15 = arith.cmpi eq, %c8_i32, %c0_i32 : i32
    %c1_i32 = arith.constant 1 : i32
    %16 = arith.select %15, %c1_i32, %c8_i32 : i32
    %17 = vector.broadcast %16 : i32 to vector<64x1xi32>
    %18 = arith.remsi %14, %17 : vector<64x1xi32>
    %c0_i32_7 = arith.constant 0 : i32
    %19 = vector.broadcast %c0_i32_7 : i32 to vector<64x1xi32>
    %20 = arith.cmpi ne, %18, %19 : vector<64x1xi32>
    %c0_i32_8 = arith.constant 0 : i32
    %21 = vector.broadcast %c0_i32_8 : i32 to vector<64x1xi32>
    %22 = arith.cmpi slt, %18, %21 : vector<64x1xi32>
    %c0_i32_9 = arith.constant 0 : i32
    %23 = arith.cmpi slt, %16, %c0_i32_9 : i32
    %24 = vector.broadcast %23 : i1 to vector<64x1xi1>
    %25 = vector.broadcast %24 : vector<64x1xi1> to vector<64x1xi1>
    %26 = arith.xori %22, %25 : vector<64x1xi1>
    %27 = arith.andi %26, %20 : vector<64x1xi1>
    %28 = vector.broadcast %16 : i32 to vector<64x1xi32>
    %29 = arith.addi %18, %28 : vector<64x1xi32>
    %30 = arith.select %27, %29, %18 : vector<64x1xi1>, vector<64x1xi32>
    %c1_i32_10 = arith.constant 1 : i32
    %31 = vector.broadcast %c1_i32_10 : i32 to vector<64x1xi32>
    %32 = arith.cmpi sge, %30, %31 : vector<64x1xi32>
    %c7_i32 = arith.constant 7 : i32
    %33 = vector.broadcast %c7_i32 : i32 to vector<64x1xi32>
    %34 = arith.cmpi slt, %30, %33 : vector<64x1xi32>
    %c0_11 = arith.constant 0 : index
    %c0_12 = arith.constant 0 : index
    %35 = vector.load %arg5[%c0_11, %c0_12] : memref<1x8xf32, #tpu.memory_space<vmem>>, vector<1x8xf32>
    %36 = vector.broadcast %35 : vector<1x8xf32> to vector<64x8xf32>
    %37 = arith.addf %3, %36 : vector<64x8xf32>
    %38 = vector.extract_strided_slice %13 {offsets = [0, 0], sizes = [64, 8], strides = [1, 1]} : vector<82x8xf32> to vector<64x8xf32>
    %cst_13 = arith.constant 0.000000e+00 : f32
    %39 = vector.shape_cast %32 : vector<64x1xi1> to vector<64x1xi1>
    %40 = vector.broadcast %39 : vector<64x1xi1> to vector<64x8xi1>
    %41 = vector.broadcast %cst_13 : f32 to vector<64x8xf32>
    %42 = arith.select %40, %38, %41 : vector<64x8xi1>, vector<64x8xf32>
    %c0_14 = arith.constant 0 : index
    %c0_15 = arith.constant 0 : index
    %43 = vector.load %arg2[%c0_14, %c0_15] : memref<72x8xf32, #tpu.memory_space<vmem>>, vector<8x8xf32>
    %cst_16 = arith.constant dense<0.000000e+00> : vector<64x8xf32>
    %44 = tpu.matmul %42, %43, %cst_16 {dimension_numbers = #tpu.dot_dimension_numbers<[1], [0], [0], [1], [0, 0, 1, 1], [], []>} : vector<64x8xf32>, vector<8x8xf32>, vector<64x8xf32> -> vector<64x8xf32>
    %45 = arith.addf %37, %44 : vector<64x8xf32>
    %46 = vector.extract_strided_slice %13 {offsets = [1, 0], sizes = [64, 8], strides = [1, 1]} : vector<82x8xf32> to vector<64x8xf32>
    %c8 = arith.constant 8 : index
    %c0_17 = arith.constant 0 : index
    %47 = vector.load %arg2[%c8, %c0_17] : memref<72x8xf32, #tpu.memory_space<vmem>>, vector<8x8xf32>
    %cst_18 = arith.constant dense<0.000000e+00> : vector<64x8xf32>
    %48 = tpu.matmul %46, %47, %cst_18 {dimension_numbers = #tpu.dot_dimension_numbers<[1], [0], [0], [1], [0, 0, 1, 1], [], []>} : vector<64x8xf32>, vector<8x8xf32>, vector<64x8xf32> -> vector<64x8xf32>
    %49 = arith.addf %45, %48 : vector<64x8xf32>
    %50 = vector.extract_strided_slice %13 {offsets = [2, 0], sizes = [64, 8], strides = [1, 1]} : vector<82x8xf32> to vector<64x8xf32>
    %cst_19 = arith.constant 0.000000e+00 : f32
    %51 = vector.shape_cast %34 : vector<64x1xi1> to vector<64x1xi1>
    %52 = vector.broadcast %51 : vector<64x1xi1> to vector<64x8xi1>
    %53 = vector.broadcast %cst_19 : f32 to vector<64x8xf32>
    %54 = arith.select %52, %50, %53 : vector<64x8xi1>, vector<64x8xf32>
    %c16 = arith.constant 16 : index
    %c0_20 = arith.constant 0 : index
    %55 = vector.load %arg2[%c16, %c0_20] : memref<72x8xf32, #tpu.memory_space<vmem>>, vector<8x8xf32>
    %cst_21 = arith.constant dense<0.000000e+00> : vector<64x8xf32>
    %56 = tpu.matmul %54, %55, %cst_21 {dimension_numbers = #tpu.dot_dimension_numbers<[1], [0], [0], [1], [0, 0, 1, 1], [], []>} : vector<64x8xf32>, vector<8x8xf32>, vector<64x8xf32> -> vector<64x8xf32>
    %57 = arith.addf %49, %56 : vector<64x8xf32>
    %58 = vector.extract_strided_slice %13 {offsets = [8, 0], sizes = [64, 8], strides = [1, 1]} : vector<82x8xf32> to vector<64x8xf32>
    %cst_22 = arith.constant 0.000000e+00 : f32
    %59 = vector.shape_cast %32 : vector<64x1xi1> to vector<64x1xi1>
    %60 = vector.broadcast %59 : vector<64x1xi1> to vector<64x8xi1>
    %61 = vector.broadcast %cst_22 : f32 to vector<64x8xf32>
    %62 = arith.select %60, %58, %61 : vector<64x8xi1>, vector<64x8xf32>
    %c24 = arith.constant 24 : index
    %c0_23 = arith.constant 0 : index
    %63 = vector.load %arg2[%c24, %c0_23] : memref<72x8xf32, #tpu.memory_space<vmem>>, vector<8x8xf32>
    %cst_24 = arith.constant dense<0.000000e+00> : vector<64x8xf32>
    %64 = tpu.matmul %62, %63, %cst_24 {dimension_numbers = #tpu.dot_dimension_numbers<[1], [0], [0], [1], [0, 0, 1, 1], [], []>} : vector<64x8xf32>, vector<8x8xf32>, vector<64x8xf32> -> vector<64x8xf32>
    %65 = arith.addf %57, %64 : vector<64x8xf32>
    %66 = vector.extract_strided_slice %13 {offsets = [9, 0], sizes = [64, 8], strides = [1, 1]} : vector<82x8xf32> to vector<64x8xf32>
    %c32 = arith.constant 32 : index
    %c0_25 = arith.constant 0 : index
    %67 = vector.load %arg2[%c32, %c0_25] : memref<72x8xf32, #tpu.memory_space<vmem>>, vector<8x8xf32>
    %cst_26 = arith.constant dense<0.000000e+00> : vector<64x8xf32>
    %68 = tpu.matmul %66, %67, %cst_26 {dimension_numbers = #tpu.dot_dimension_numbers<[1], [0], [0], [1], [0, 0, 1, 1], [], []>} : vector<64x8xf32>, vector<8x8xf32>, vector<64x8xf32> -> vector<64x8xf32>
    %69 = arith.addf %65, %68 : vector<64x8xf32>
    %70 = vector.extract_strided_slice %13 {offsets = [10, 0], sizes = [64, 8], strides = [1, 1]} : vector<82x8xf32> to vector<64x8xf32>
    %cst_27 = arith.constant 0.000000e+00 : f32
    %71 = vector.shape_cast %34 : vector<64x1xi1> to vector<64x1xi1>
    %72 = vector.broadcast %71 : vector<64x1xi1> to vector<64x8xi1>
    %73 = vector.broadcast %cst_27 : f32 to vector<64x8xf32>
    %74 = arith.select %72, %70, %73 : vector<64x8xi1>, vector<64x8xf32>
    %c40 = arith.constant 40 : index
    %c0_28 = arith.constant 0 : index
    %75 = vector.load %arg2[%c40, %c0_28] : memref<72x8xf32, #tpu.memory_space<vmem>>, vector<8x8xf32>
    %cst_29 = arith.constant dense<0.000000e+00> : vector<64x8xf32>
    %76 = tpu.matmul %74, %75, %cst_29 {dimension_numbers = #tpu.dot_dimension_numbers<[1], [0], [0], [1], [0, 0, 1, 1], [], []>} : vector<64x8xf32>, vector<8x8xf32>, vector<64x8xf32> -> vector<64x8xf32>
    %77 = arith.addf %69, %76 : vector<64x8xf32>
    %78 = vector.extract_strided_slice %13 {offsets = [16, 0], sizes = [64, 8], strides = [1, 1]} : vector<82x8xf32> to vector<64x8xf32>
    %cst_30 = arith.constant 0.000000e+00 : f32
    %79 = vector.shape_cast %32 : vector<64x1xi1> to vector<64x1xi1>
    %80 = vector.broadcast %79 : vector<64x1xi1> to vector<64x8xi1>
    %81 = vector.broadcast %cst_30 : f32 to vector<64x8xf32>
    %82 = arith.select %80, %78, %81 : vector<64x8xi1>, vector<64x8xf32>
    %c48 = arith.constant 48 : index
    %c0_31 = arith.constant 0 : index
    %83 = vector.load %arg2[%c48, %c0_31] : memref<72x8xf32, #tpu.memory_space<vmem>>, vector<8x8xf32>
    %cst_32 = arith.constant dense<0.000000e+00> : vector<64x8xf32>
    %84 = tpu.matmul %82, %83, %cst_32 {dimension_numbers = #tpu.dot_dimension_numbers<[1], [0], [0], [1], [0, 0, 1, 1], [], []>} : vector<64x8xf32>, vector<8x8xf32>, vector<64x8xf32> -> vector<64x8xf32>
    %85 = arith.addf %77, %84 : vector<64x8xf32>
    %86 = vector.extract_strided_slice %13 {offsets = [17, 0], sizes = [64, 8], strides = [1, 1]} : vector<82x8xf32> to vector<64x8xf32>
    %c56 = arith.constant 56 : index
    %c0_33 = arith.constant 0 : index
    %87 = vector.load %arg2[%c56, %c0_33] : memref<72x8xf32, #tpu.memory_space<vmem>>, vector<8x8xf32>
    %cst_34 = arith.constant dense<0.000000e+00> : vector<64x8xf32>
    %88 = tpu.matmul %86, %87, %cst_34 {dimension_numbers = #tpu.dot_dimension_numbers<[1], [0], [0], [1], [0, 0, 1, 1], [], []>} : vector<64x8xf32>, vector<8x8xf32>, vector<64x8xf32> -> vector<64x8xf32>
    %89 = arith.addf %85, %88 : vector<64x8xf32>
    %90 = vector.extract_strided_slice %13 {offsets = [18, 0], sizes = [64, 8], strides = [1, 1]} : vector<82x8xf32> to vector<64x8xf32>
    %cst_35 = arith.constant 0.000000e+00 : f32
    %91 = vector.shape_cast %34 : vector<64x1xi1> to vector<64x1xi1>
    %92 = vector.broadcast %91 : vector<64x1xi1> to vector<64x8xi1>
    %93 = vector.broadcast %cst_35 : f32 to vector<64x8xf32>
    %94 = arith.select %92, %90, %93 : vector<64x8xi1>, vector<64x8xf32>
    %c64 = arith.constant 64 : index
    %c0_36 = arith.constant 0 : index
    %95 = vector.load %arg2[%c64, %c0_36] : memref<72x8xf32, #tpu.memory_space<vmem>>, vector<8x8xf32>
    %cst_37 = arith.constant dense<0.000000e+00> : vector<64x8xf32>
    %96 = tpu.matmul %94, %95, %cst_37 {dimension_numbers = #tpu.dot_dimension_numbers<[1], [0], [0], [1], [0, 0, 1, 1], [], []>} : vector<64x8xf32>, vector<8x8xf32>, vector<64x8xf32> -> vector<64x8xf32>
    %97 = arith.addf %89, %96 : vector<64x8xf32>
    %c0_38 = arith.constant 0 : index
    %c0_39 = arith.constant 0 : index
    %c0_40 = arith.constant 0 : index
    %98 = vector.load %arg6[%c0_38, %c0_39, %c0_40] : memref<1x64x8xf32, #tpu.memory_space<vmem>>, vector<1x64x8xf32>
    %99 = vector.shape_cast %98 : vector<1x64x8xf32> to vector<64x8xf32>
    %100 = vector.shape_cast %97 : vector<64x8xf32> to vector<1x64x8xf32>
    tpu.vector_store %arg6[%c0_38, %c0_39, %c0_40], %100 {strides = array<i32>} : memref<1x64x8xf32, #tpu.memory_space<vmem>>, vector<1x64x8xf32>,
    return
  }
  func.func @transform_0(%arg0: i32) -> (i32, i32, i32) {
    %c0_i32 = arith.constant 0 : i32
    %c0_i32_0 = arith.constant 0 : i32
    %c0_i32_1 = arith.constant 0 : i32
    return %arg0, %c0_i32, %c0_i32_0 : i32, i32, i32
  }
  func.func @transform_1(%arg0: i32) -> (i32, i32) {
    %c0_i32 = arith.constant 0 : i32
    %c0_i32_0 = arith.constant 0 : i32
    %c0_i32_1 = arith.constant 0 : i32
    return %c0_i32, %c0_i32_0 : i32, i32
  }
  func.func @transform_2(%arg0: i32) -> (i32, i32) {
    %c0_i32 = arith.constant 0 : i32
    %c0_i32_0 = arith.constant 0 : i32
    %c0_i32_1 = arith.constant 0 : i32
    return %c0_i32, %c0_i32_0 : i32, i32
  }
  func.func @transform_3(%arg0: i32) -> (i32, i32) {
    %c0_i32 = arith.constant 0 : i32
    %c0_i32_0 = arith.constant 0 : i32
    %c0_i32_1 = arith.constant 0 : i32
    return %c0_i32, %c0_i32_0 : i32, i32
  }
  func.func @transform_4(%arg0: i32) -> (i32, i32) {
    %c0_i32 = arith.constant 0 : i32
    %c0_i32_0 = arith.constant 0 : i32
    %c0_i32_1 = arith.constant 0 : i32
    return %c0_i32, %c0_i32_0 : i32, i32
  }
  func.func @transform_5(%arg0: i32) -> (i32, i32, i32) {
    %c0_i32 = arith.constant 0 : i32
    %c0_i32_0 = arith.constant 0 : i32
    %c0_i32_1 = arith.constant 0 : i32
    return %arg0, %c0_i32, %c0_i32_0 : i32, i32, i32
  }
}

</mosaic_0001>

<bundles_post_ra>
// kernel: residual_block_forward.2
= control target key start
LH: loop header
LB: loop body
LE: loop exit
PB: predicated region body
PF: predicated region fallthrough
CT: control target
= control target key end

     0   :  { %s629_s15 = smov 0   ;;  %s725_s0 = inlined_call_operand.vmem [shape: f32[128,36], index: 0, kind: input, shape index: {}]   ;;  %s726_s1 = inlined_call_operand.vmem [shape: f32[36,16], index: 1, kind: input, shape index: {}]   ;;  %s727_s2 = inlined_call_operand.vmem [shape: f32[1,16], index: 2, kind: input, shape index: {}]   ;;  %s728_s3 = inlined_call_operand.vmem [shape: f32[128,16], index: 3, kind: output, shape index: {0}]   ;;  %s729_s4 = inlined_call_operand.vmem [shape: f32[2,2,8], index: 4, kind: output, shape index: {1}]  }
   0x1 LB: > { %s635_s16 = sadd.s32 4294967295, %s602_s15   ;;  %p521_p0 = scmp.ge.s32.totalorder %s602_s15, 1  ;;  %s602_s15 = sphi %s629_s15, %s15_s15  }
   0x2   : > { %p166_p1 = scmp.lt.s32.totalorder %s602_s15, 3 }
   0x4   : > { %p167_p2 = pnand %p521_p0, %p166_p1 }
   0x5   : > { %v220_v0 = vld [vmem:[%s726_s1] sm:$0xff] (!%p167_p2)  ;;  %v221_v1 = vld [vmem:[%s726_s1 + $0x8] sm:$0xff] (!%p167_p2)  ;;  %v222_v2 = vld [vmem:[%s726_s1 + $0x10] sm:$0xff] (!%p167_p2)  ;;  %s522_s23 = sshll.u32 (!%p167_p2), %s635_s16, 3  ;;  %vm232_vm0 = vcmask (!%p167_p2), 293888   ;;  %vm257_vm1 = vcmask (!%p167_p2), 1043456  }
   0x6   : > { %170 = sbr.rel (%p167_p2) target bundleno = 266 (0x10a), region = 32  ;;  %v574_v3 = vpack.c.bf16 (!%p167_p2), %v221_v1, %v220_v0  ;;  %v223_v4 = vld [vmem:[%s726_s1 + $0x18] sm:$0xff] (!%p167_p2)  ;;  %p197_p3 = scmp.lt.s32.totalorder (!%p167_p2), %s522_s23, 15  ;;  %v224_v6 = vld [vmem:[%s726_s1 + $0x20] sm:$0xf] (!%p167_p2)  ;;  %vm366_vm2 = vcmask (!%p167_p2), 130048  }
   0x7   : > { %v578_v5 = vpack.c.bf16 (!%p167_p2), %v223_v4, %v222_v2  ;;  %v527_v15 = vld [vmem:[%s727_s2] ss:$0 sm:$0xff] (!%p167_p2)  ;;  %vm375_vm3 = vcmask (!%p167_p2), 64512   ;;  %p208_p4 = scmp.lt.s32.totalorder (!%p167_p2), %s635_s16, 1  ;;  %vm426_vm4 = vcmask (!%p167_p2), 1040384   ;;  %vm428_vm5 = vcmask (!%p167_p2), 58368  }
   0x8   : > { %575 = vmatprep.subr.bf16.mxu0 (!%p167_p2), %v574_v3  ;;  %582 = vmatprep.subr.bf16.mxu1 (!%p167_p2), %v574_v3 }
   0x9   : > { %577 = vmatpush3.bf16.msra.mxu0 (!%p167_p2), %v574_v3  ;;  %585 = vmatpush3.bf16.msra.mxu1 (!%p167_p2), %v574_v3 }
   0xa   : > { %579 = vmatprep.subr.bf16.mxu0 (!%p167_p2), %v578_v5  ;;  %583 = vmatprep.subr.bf16.mxu1 (!%p167_p2), %v578_v5 }
   0xd   : > { %s731_s23 = smov (!%p197_p3, %s522_s23), 15  ;;  %581 = vmatpush3.bf16.msra.mxu0 %v578_v5  ;;  %586 = vmatpush3.bf16.msra.mxu1 %v578_v5  ;;  %s733_s16 = smov (!%p208_p4, %s635_s16), 1 }
   0xe   : > { %s523_s26 = sshll.u32 %s731_s23, 3  ;;  %560 = vmatprep.subr.msk.mxu0 %vm257_vm1, %v224_v6  ;;  %584 = vmatprep.subr.msk.mxu1 %vm257_vm1, %v224_v6  ;;  %s526_s11 = sshll.u32 %s733_s16, 1 }
   0xf   : > { %s200_s5 = scalar_lea.vmem %s725_s0, %s523_s26  ;;  %s683_s10 = scalar_lea.vmem %s728_s3, %s523_s26 }
  0x10   : > { %v212_v7 = vld [vmem:[%s200_s5] sm:$0xff]  ;;  %v213_v9 = vld [vmem:[%s200_s5 + $0x8] sm:$0xff]  ;;  %v214_v10 = vld [vmem:[%s200_s5 + $0x10] sm:$0xff]  ;;  %s211_s14 = scalar_lea.vmem %s729_s4, %s526_s11 }
  0x11   : > { %562 = vmatprep.mubr.msk.f32.mxu0 %vm232_vm0, %v212_v7  ;;  %v216_v8 = vld [vmem:[%s200_s5 + $0x20] sm:$0xff]  ;;  %v217_v11 = vld [vmem:[%s200_s5 + $0x28] sm:$0xff]  ;;  %561 = vmatpush3.msk.msra.mxu0 %vm257_vm1, %v224_v6  ;;  %v218_v12 = vld [vmem:[%s200_s5 + $0x30] sm:$0xff] }
  0x12   : > { %568 = vmatprep.mubr.msk.f32.mxu1 %vm232_vm0, %v216_v8  ;;  %563 = vmatmul.mubr.msk.f32.vlgmr.msra.gmra.mrb[0].mxu0 %vm232_vm0, %v213_v9  ;;  %v215_v13 = vld [vmem:[%s200_s5 + $0x18] sm:$0xff] }
  0x13   : > { %587 = vmatpush3.msk.msra.mxu1 %vm257_vm1, %v224_v6  ;;  %565 = vmatprep.mubr.msk.f32.mxu0 %vm232_vm0, %v214_v10  ;;  %v219_v14 = vld [vmem:[%s200_s5 + $0x38] sm:$0xff] }
  0x14   : > { %569 = vmatmul.mubr.msk.f32.vlgmr.msra.gmra.mrb[0].mxu1 %vm232_vm0, %v217_v11 }
  0x15   : > { %571 = vmatprep.mubr.msk.f32.mxu1 %vm232_vm0, %v218_v12 }
  0x16   : > { %566 = vmatmul.mubr.msk.f32.gmra.mrb[2].mxu0 %vm232_vm0, %v215_v13 }
  0x18   : > { %572 = vmatmul.mubr.msk.f32.gmra.mrb[2].mxu1 %vm232_vm0, %v219_v14 }
  0xe5   : > { %v564_v16 = vpop.f32.mrb[0].mxu0 }
  0xe6   : > { %v333_v17 = vadd.f32 %v564_v16, %v527_v15  ;;  %v327_v18 = vpop.f32.mrb[1].mxu0 }
  0xe7   : > { %v570_v19 = vpop.f32.mrb[0].mxu1  ;;  %v328_v20 = vadd.f32 %v527_v15, %v327_v18 }
  0xe8   : > { %v353_v21 = vadd.f32 %v570_v19, %v527_v15  ;;  %v347_v22 = vpop.f32.mrb[1].mxu1  ;;  %368 = vst.msk [vmem:[%s683_s10 + $0x8] sm:$0xff] %vm366_vm2, %v333_v17  ;;  %v377_v23 = vsel %vm375_vm3, %v333_v17, 0.0  ;;  %v398_v24 = vmul.f32 %v333_v17, %v333_v17 }
  0xe9   : > { %v348_v25 = vadd.f32 %v527_v15, %v347_v22  ;;  %367 = vst.msk [vmem:[%s683_s10] sm:$0xff] %vm366_vm2, %v328_v20  ;;  %v376_v26 = vsel %vm375_vm3, %v328_v20, 0.0  ;;  %v397_v27 = vmul.f32 %v328_v20, %v328_v20  ;;  %v567_v28 = vpop.f32.mrb[2].mxu0 }
  0xea   : > { %372 = vst.msk [vmem:[%s683_s10 + $0x28] sm:$0xff] %vm366_vm2, %v353_v21  ;;  %v406_v29 = vsel %vm375_vm3, %v398_v24, 0.0  ;;  %v378_v30 = vadd.f32 %v377_v23, %v376_v26  ;;  %v343_v31 = vadd.f32 %v567_v28, %v527_v15  ;;  %v337_v32 = vpop.f32.mrb[3].mxu0  ;;  %v402_v51 = vmul.f32 %v353_v21, %v353_v21 }
  0xeb   : > { %371 = vst.msk [vmem:[%s683_s10 + $0x20] sm:$0xff] %vm366_vm2, %v348_v25  ;;  %v573_v33 = vpop.f32.mrb[2].mxu1  ;;  %v405_v34 = vsel %vm375_vm3, %v397_v27, 0.0  ;;  %v338_v35 = vadd.f32 %v527_v15, %v337_v32  ;;  %v401_v38 = vmul.f32 %v348_v25, %v348_v25  ;;  %v383_v47 = vsel %vm375_vm3, %v348_v25, 0.0 }
  0xec   : > { %v357_v36 = vpop.f32.mrb[3].mxu1  ;;  %v407_v37 = vadd.f32 %v406_v29, %v405_v34  ;;  %370 = vst.msk [vmem:[%s683_s10 + $0x18] sm:$0xff] %vm366_vm2, %v343_v31  ;;  %v363_v39 = vadd.f32 %v573_v33, %v527_v15  ;;  %v400_v40 = vmul.f32 %v343_v31, %v343_v31  ;;  %v381_v45 = vsel %vm375_vm3, %v343_v31, 0.0 }
  0xed   : > { %369 = vst.msk [vmem:[%s683_s10 + $0x10] sm:$0xff] %vm366_vm2, %v338_v35  ;;  %v379_v41 = vsel %vm375_vm3, %v338_v35, 0.0  ;;  %v399_v42 = vmul.f32 %v338_v35, %v338_v35  ;;  %v358_v43 = vadd.f32 %v527_v15, %v357_v36  ;;  %v412_v52 = vsel %vm375_vm3, %v401_v38, 0.0 }
  0xee   : > { %v380_v44 = vadd.f32 %v379_v41, %v378_v30  ;;  %374 = vst.msk [vmem:[%s683_s10 + $0x38] sm:$0xff] %vm366_vm2, %v363_v39  ;;  %v410_v50 = vsel %vm375_vm3, %v400_v40, 0.0  ;;  %v385_v56 = vsel %vm375_vm3, %v353_v21, 0.0  ;;  %v414_v60 = vsel %vm375_vm3, %v402_v51, 0.0 }
  0xef   : > { %v408_v46 = vsel %vm375_vm3, %v399_v42, 0.0  ;;  %373 = vst.msk [vmem:[%s683_s10 + $0x30] sm:$0xff] %vm366_vm2, %v358_v43  ;;  %v403_v53 = vmul.f32 %v358_v43, %v358_v43  ;;  %v387_v57 = vsel %vm375_vm3, %v358_v43, 0.0  ;;  %v404_v61 = vmul.f32 %v363_v39, %v363_v39 }
  0xf0   : > { %v409_v48 = vadd.f32 %v408_v46, %v407_v37  ;;  %v382_v49 = vadd.f32 %v381_v45, %v380_v44  ;;  %v389_v1 = vsel %vm375_vm3, %v363_v39, 0.0 }
  0xf1   : > { %v416_v62 = vsel %vm375_vm3, %v403_v53, 0.0  ;;  %v418_v4 = vsel %vm375_vm3, %v404_v61, 0.0 }
  0xf2   : > { %v384_v54 = vadd.f32 %v383_v47, %v382_v49  ;;  %v411_v55 = vadd.f32 %v410_v50, %v409_v48 }
  0xf4   : > { %v413_v58 = vadd.f32 %v412_v52, %v411_v55  ;;  %v386_v59 = vadd.f32 %v385_v56, %v384_v54 }
  0xf6   : > { %v388_v63 = vadd.f32 %v387_v57, %v386_v59  ;;  %v415_v0 = vadd.f32 %v414_v60, %v413_v58 }
  0xf8   : > { %v390_v2 = vadd.f32 %v389_v1, %v388_v63  ;;  %v417_v3 = vadd.f32 %v416_v62, %v415_v0 }
  0xfa   : > { %v391_v5 = vrot.slane %v390_v2, 4  ;;  %v419_v6 = vadd.f32 %v418_v4, %v417_v3 }
  0xfc   : > { %v392_v7 = vadd.f32 %v391_v5, %v390_v2  ;;  %v420_v8 = vrot.slane %v419_v6, 4 }
  0xfe   : > { %v393_v9 = vrot.slane %v392_v7, 2  ;;  %v421_v10 = vadd.f32 %v420_v8, %v419_v6 }
 0x100   : > { %v394_v11 = vadd.f32 %v393_v9, %v392_v7  ;;  %v422_v12 = vrot.slane %v421_v10, 2 }
 0x102   : > { %v395_v13 = vrot.slane %v394_v11, 1  ;;  %v423_v14 = vadd.f32 %v422_v12, %v421_v10 }
 0x104   : > { %v424_v15 = vrot.slane %v423_v14, 1  ;;  %v396_v16 = vadd.f32 %v395_v13, %v394_v11 }
 0x106   : > { %v425_v17 = vadd.f32 %v424_v15, %v423_v14 }
 0x108   : > { %v427_v18 = vsel %vm426_vm4, %v396_v16, %v425_v17 }
 0x109   : > { %429 = vst.msk [vmem:[%s211_s14] sm:$0x3] %vm428_vm5, %v427_v18 }
 0x10a PF: > { %s15_s15 = sadd.s32 1, %s602_s15  }
 0x10b   : > { %p12_p5 = scmp.ge.s32.totalorder %s15_s15, 4  }
 0x10d   :  { %14 = sbr.rel (!%p12_p5) target bundleno = 1 (0x1), region = 74 }

// kernel: residual_block_forward.3
= control target key start
LH: loop header
LB: loop body
LE: loop exit
PB: predicated region body
PF: predicated region fallthrough
CT: control target
= control target key end

     0   :  { %s2499_s18 = smov 0   ;;  %s3235_s0 = inlined_call_operand.vmem [shape: f32[2,64,16], index: 0, kind: input, shape index: {}]   ;;  %s3236_s1 = inlined_call_operand.vmem [shape: f32[72,8], index: 1, kind: input, shape index: {}]   ;;  %s3237_s2 = inlined_call_operand.vmem [shape: f32[1,8], index: 2, kind: input, shape index: {}]   ;;  %s3238_s3 = inlined_call_operand.vmem [shape: f32[1,8], index: 3, kind: input, shape index: {}]   ;;  %s3239_s4 = inlined_call_operand.vmem [shape: f32[1,8], index: 4, kind: input, shape index: {}]   ;;  %s3240_s5 = inlined_call_operand.vmem [shape: f32[2,64,8], index: 5, kind: output, shape index: {}]  }
   0x1 LB: > { %s2151_s19 = sadd.s32 4294967295, %s2464_s18   ;;  %p2155_p0 = scmp.ge.s32.totalorder %s2464_s18, 1  ;;  %s2464_s18 = sphi %s2499_s18, %s15_s18  }
   0x2   : > { %p187_p1 = scmp.lt.s32.totalorder %s2464_s18, 3 }
   0x4   : > { %p188_p2 = pnand %p2155_p0, %p187_p1 }
   0x5   : > { %v467_v0 = vld [vmem:[%s3236_s1] sm:$0xff] (!%p188_p2)  ;;  %p215_p3 = scmp.lt.s32.totalorder (!%p188_p2), %s2151_s19, 1  ;;  %v306_v1 = vlaneseq (!%p188_p2)  ;;  %v2466_v2 = vmov (!%p188_p2), 0.0   ;;  %v2513_v3 = vld [vmem:[%s3236_s1 + $0x10] sm:$0xff] (!%p188_p2)  ;;  %v2522_v5 = vld [vmem:[%s3236_s1 + $0x8] sm:$0xff] (!%p188_p2)  ;;  %vm3241_vm0 = vcmask (!%p188_p2), 1040384  }
   0x6   : > { %191 = sbr.rel (%p188_p2) target bundleno = 613 (0x265), region = 40  ;;  %2319 = vmatprep.subr.mxu0 (!%p188_p2), %v467_v0  ;;  %2321 = vmatprep.mubr.f32.mxu0 (!%p188_p2), %v2466_v2  ;;  %v2527_v6 = vld [vmem:[%s3237_s2] ss:$0 sm:$0xff] (!%p188_p2)  ;;  %v2542_v11 = vrot.slane (!%p188_p2), %v2466_v2, 1  ;;  %v2544_v12 = vrot.slane (!%p188_p2), %v2466_v2, 2  ;;  %vm468_vm1 = vcmask (!%p188_p2), 64512  }
   0x7   : > { %2320 = vmatpush3.msra.mxu0 (!%p188_p2), %v467_v0  ;;  %v2517_v4 = vshrl.u32 (!%p188_p2), %v306_v1, 7  ;;  %2445 = vmatprep.subr.mxu1 (!%p188_p2), %v467_v0  ;;  %v2556_v13 = vld [vmem:[%s3238_s3] ss:$0 sm:$0xff] (!%p188_p2)  ;;  %vm3242_vm4 = vcmask (!%p188_p2), 1045504   ;;  %s2467_s11 = smov (!%p188_p2), 8   ;;  %vm640_vm11 = vcmask (!%p188_p2), 1046528  }
   0x8   : > { %2446 = vmatpush3.msra.mxu1 (!%p188_p2), %v467_v0  ;;  %2347 = vmatprep.subr.mxu0 (!%p188_p2), %v2513_v3  ;;  %v2162_v36 = vld [vmem:[%s3239_s4] ss:$0 sm:$0xff] (!%p188_p2)  ;;  %s2468_s26 = smov (!%p188_p2), 120  }
   0x9   : > { %v308_v7 = vadd.s32 (!%p188_p2), 8, %v2517_v4  ;;  %v2533_v8 = vadd.s32 (!%p188_p2), 32, %v2517_v4  ;;  %v2536_v9 = vadd.s32 (!%p188_p2), 40, %v2517_v4  ;;  %v2539_v10 = vadd.s32 (!%p188_p2), 16, %v2517_v4  ;;  %2333 = vmatprep.subr.mxu1 (!%p188_p2), %v2522_v5  ;;  %433 = vrot.lane.b32.xlu0 (!%p188_p2), %v2162_v36, %s2467_s11 }
   0xa   : > { %v2559_v14 = vadd.s32 (!%p188_p2), 24, %v2517_v4  ;;  %v2572_v20 = vadd.s32 (!%p188_p2), 48, %v2517_v4  ;;  %v2587_v26 = vadd.s32 (!%p188_p2), 56, %v2517_v4  ;;  %v319_v30 = vand.u32 (!%p188_p2), 7, %v2517_v4 }
   0xb   : > { %v326_v18 = vand.u32 (!%p188_p2), 7, %v308_v7  ;;  %v347_v19 = vand.u32 (!%p188_p2), 7, %v2533_v8  ;;  %v354_v28 = vand.u32 (!%p188_p2), 7, %v2536_v9  ;;  %v333_v29 = vand.u32 (!%p188_p2), 7, %v2539_v10 }
   0xc   : > { %v340_v40 = vand.u32 (!%p188_p2), 7, %v2559_v14  ;;  %v361_v1 = vand.u32 (!%p188_p2), 7, %v2572_v20  ;;  %vm2697_vm9 = vcmp.lt.s32.totalorder (!%p188_p2), %v319_v30, 7  ;;  %v3273_v14 = vmov (!%p188_p2), 0 }
   0xd   : > { %s3295_s19 = smov (!%p215_p3, %s2151_s19), 1  ;;  %vm2605_vm2 = vcmp.ge.s32.totalorder %v326_v18, 1  ;;  %vm2612_vm3 = vcmp.ge.s32.totalorder %v347_v19, 1  ;;  %vm2624_vm5 = vcmp.ge.s32.totalorder %v354_v28, 1  ;;  %vm2630_vm6 = vcmp.ge.s32.totalorder %v333_v29, 1 }
   0xe   : > { %s2236_s28 = sshll.u32 %s3295_s19, 6  ;;  %vm2638_vm7 = vcmp.ge.s32.totalorder %v340_v40, 1  ;;  %vm2654_vm8 = vcmp.lt.s32.totalorder %v326_v18, 7  ;;  %vm2706_vm10 = vcmp.ge.s32.totalorder %v361_v1, 1  ;;  %vm2743_vm13 = vcmp.lt.s32.totalorder %v333_v29, 7 }
   0xf   : > { %s2551_s6 = scalar_lea.vmem %s3235_s0, %s2236_s28  ;;  %vm2755_vm14 = vcmp.lt.s32.totalorder %v340_v40, 7  ;;  %vm2770_vm15 = vcmp.lt.s32.totalorder %v347_v19, 7  ;;  %s224_s30 = scalar_lea.vmem %s3240_s5, %s2236_s28 }
  0x10   : > { %v2562_v15 = vld [vmem:[%s2551_s6] sm:$0xff]  ;;  %v2565_v16 = vld [vmem:[%s2551_s6 + $0x8] sm:$0xff]  ;;  %v2568_v17 = vld [vmem:[%s2551_s6 + $0x10] sm:$0xff]  ;;  %v3274_v14 = vsel %vm2770_vm15, 4294967295, %v3273_v14 }
  0x11   : > { %v240_v21 = vmul.f32 %v2527_v6, %v2562_v15  ;;  %v241_v22 = vmul.f32 %v2527_v6, %v2565_v16  ;;  %v242_v23 = vmul.f32 %v2527_v6, %v2568_v17  ;;  %v2581_v24 = vld [vmem:[%s2551_s6 + $0x18] sm:$0xff]  ;;  %v2584_v25 = vld [vmem:[%s2551_s6 + $0x20] sm:$0xff]  ;;  %v2600_v35 = vld [vmem:[%s2551_s6 + $0x28] sm:$0xff] }
  0x12   : > { %v243_v27 = vmul.f32 %v2527_v6, %v2581_v24  ;;  %v244_v34 = vmul.f32 %v2527_v6, %v2584_v25  ;;  %v2620_v45 = vld [vmem:[%s2551_s6 + $0x30] sm:$0xff]  ;;  %v245_v49 = vmul.f32 %v2527_v6, %v2600_v35  ;;  %v2789_v19 = vld [vmem:[%s2551_s6 + $0x38] sm:$0xff] }
  0x13   : > { %v255_v31 = vadd.f32 %v2556_v13, %v240_v21  ;;  %v256_v32 = vadd.f32 %v2556_v13, %v241_v22  ;;  %v257_v33 = vadd.f32 %v2556_v13, %v242_v23  ;;  %v246_v57 = vmul.f32 %v2527_v6, %v2620_v45  ;;  %v1217_v22 = vld [vmem:[%s3236_s1 + $0x20] sm:$0xff] }
  0x14   : > { %v258_v38 = vadd.f32 %v2556_v13, %v243_v27  ;;  %v259_v44 = vadd.f32 %v2556_v13, %v244_v34  ;;  %v260_v56 = vadd.f32 %v2556_v13, %v245_v49 }
  0x15   : > { %v263_v41 = vmax.f32 %v255_v31, 0.0  ;;  %v264_v42 = vmax.f32 %v256_v32, 0.0  ;;  %v265_v43 = vmax.f32 %v257_v33, 0.0  ;;  %v261_v31 = vadd.f32 %v2556_v13, %v246_v57  ;;  %v2691_v33 = vld [vmem:[%s3236_s1 + $0x18] sm:$0xff] }
  0x16   : > { %v266_v46 = vmax.f32 %v258_v38, 0.0  ;;  %v267_v53 = vmax.f32 %v259_v44, 0.0  ;;  %v268_v27 = vmax.f32 %v260_v56, 0.0  ;;  %v368_v32 = vand.u32 7, %v2587_v26 }
  0x17   : > { %v280_v50 = vrot.slane %v263_v41, 7  ;;  %v281_v51 = vrot.slane %v264_v42, 7  ;;  %v283_v52 = vrot.slane %v265_v43, 7 }
  0x18   : > { %v285_v54 = vrot.slane %v266_v46, 7  ;;  %v287_v61 = vrot.slane %v267_v53, 7  ;;  %v289_v42 = vrot.slane %v268_v27, 7  ;;  %vm2714_vm12 = vcmp.ge.s32.totalorder %v368_v32, 1 }
  0x19   : > { %v2646_v58 = vsel %vm3241_vm0, %v280_v50, %v281_v51  ;;  %v2649_v59 = vsel %vm3241_vm0, %v281_v51, %v283_v52  ;;  %v2652_v60 = vsel %vm3241_vm0, 0.0, %v280_v50 }
  0x1a   : > { %v460_v63 = vsel %vm2605_vm2, %v2652_v60, 0.0  ;;  %v2662_v0 = vsel %vm3241_vm0, %v283_v52, %v285_v54  ;;  %v2670_v7 = vsel %vm3241_vm0, %v285_v54, %v287_v61  ;;  %v461_v18 = vsel %vm2630_vm6, %v2646_v58, 0.0 }
  0x1b   : > { %2322 = vmatmul.mubr.msk.f32.vlgmr.msra.gmra.mrb[0].mxu0 %vm468_vm1, %v460_v63  ;;  %v463_v2 = vsel %vm2612_vm3, %v2662_v0, 0.0  ;;  %v462_v21 = vsel %vm2638_vm7, %v2649_v59, 0.0  ;;  %v464_v23 = vsel %vm2624_vm5, %v2670_v7, 0.0  ;;  %v837_v36 = vrot.slane %v2652_v60, 2 }
  0x1c   : > { %2327 = vmatprep.mubr.msk.f32.mxu1 %vm468_vm1, %v463_v2  ;;  %2324 = vmatprep.mubr.msk.f32.mxu0 %vm468_vm1, %v461_v18  ;;  %v839_v38 = vrot.slane %v2646_v58, 2  ;;  %v642_v41 = vrot.slane %v2652_v60, 1  ;;  %v644_v50 = vrot.slane %v2646_v58, 1  ;;  %v3271_v2 = vmov 0 }
  0x1d   : > { %2328 = vmatmul.mubr.msk.f32.vlgmr.msra.gmra.mrb[0].mxu1 %vm468_vm1, %v464_v23  ;;  %2348 = vmatpush3.msra.mxu0 %v2513_v3  ;;  %v269_v3 = vmax.f32 %v261_v31, 0.0  ;;  %v838_v46 = vsel %vm3242_vm4, %v2544_v12, %v837_v36  ;;  %v3272_v2 = vsel %vm2755_vm14, 4294967295, %v3271_v2  ;;  %v843_v10 = vrot.slane %v2662_v0, 2  ;;  %v2778_v23 = vld [vmem:[%s3236_s1 + $0x30] sm:$0xff] }
  0x1e   : > { %2334 = vmatpush3.msra.mxu1 %v2522_v5  ;;  %2375 = vmatprep.subr.mxu0 %v1217_v22  ;;  %v2721_v49 = vsel %vm3242_vm4, %v837_v36, %v839_v38  ;;  %v2726_v5 = vsel %vm3241_vm0, %v287_v61, %v289_v42  ;;  %v861_v52 = vsel %vm2697_vm9, %v838_v46, 0.0  ;;  %v643_v56 = vsel %vm640_vm11, %v2542_v11, %v642_v41 }
  0x1f   : > { %2325 = vmatmul.mubr.msk.f32.gmra.mrb[2].mxu0 %vm468_vm1, %v462_v21  ;;  %2361 = vmatprep.subr.mxu1 %v2691_v33  ;;  %v2728_v51 = vrot.slane %v269_v3, 7  ;;  %v862_v53 = vsel %vm2654_vm8, %v2721_v49, 0.0  ;;  %v465_v54 = vsel %vm2706_vm10, %v2726_v5, 0.0  ;;  %v841_v61 = vrot.slane %v2649_v59, 2 }
  0x20   : > { %2349 = vmatprep.mubr.msk.f32.mxu0 %vm468_vm1, %v861_v52  ;;  %2330 = vmatprep.mubr.msk.f32.mxu1 %vm468_vm1, %v465_v54  ;;  %v646_v29 = vrot.slane %v2649_v59, 1  ;;  %v845_v40 = vrot.slane %v2670_v7, 2  ;;  %v648_v8 = vrot.slane %v2662_v0, 1  ;;  %v645_v36 = vsel %vm640_vm11, %v642_v41, %v644_v50 }
  0x21   : > { %v2751_v63 = vsel %vm3241_vm0, %v289_v42, %v2728_v51  ;;  %v2766_v21 = vsel %vm3242_vm4, %v839_v38, %v841_v61  ;;  %v2785_v31 = vsel %vm3242_vm4, %v841_v61, %v843_v10  ;;  %vm2808_vm0 = vcmp.lt.s32.totalorder %v354_v28, 7 }
  0x22   : > { %v466_v18 = vsel %vm2714_vm12, %v2751_v63, 0.0  ;;  %v863_v27 = vsel %vm2743_vm13, %v2766_v21, 0.0  ;;  %v864_v38 = vsel %vm2755_vm14, %v2785_v31, 0.0  ;;  %v2798_v42 = vsel %vm640_vm11, %v644_v50, %v646_v29 }
  0x23   : > { %2350 = vmatmul.mubr.msk.f32.vlgmr.msra.gmra.mrb[4].mxu0 %vm468_vm1, %v862_v53  ;;  %2331 = vmatmul.mubr.msk.f32.gmra.mrb[2].mxu1 %vm468_vm1, %v466_v18  ;;  %v2801_v3 = vsel %vm3242_vm4, %v843_v10, %v845_v40  ;;  %v3275_v41 = vmov 0  ;;  %v847_v46 = vrot.slane %v2726_v5, 2  ;;  %v650_v52 = vrot.slane %v2670_v7, 1  ;;  %v1379_v53 = vld [vmem:[%s3236_s1 + $0x28] sm:$0xff] }
  0x24   : > { %2376 = vmatpush3.msra.mxu0 %v1217_v22  ;;  %2335 = vmatprep.mubr.msk.f32.mxu1 %vm468_vm1, %v643_v56  ;;  %v865_v22 = vsel %vm2770_vm15, %v2801_v3, 0.0  ;;  %v3276_v41 = vsel %vm2808_vm0, 4294967295, %v3275_v41  ;;  %vm2818_vm4 = vcmp.lt.s32.totalorder %v361_v1, 7  ;;  %v3277_v50 = vmov 0 }
  0x25   : > { %2352 = vmatprep.mubr.msk.f32.mxu0 %vm468_vm1, %v863_v27  ;;  %2403 = vmatprep.subr.mxu0 %v2778_v23  ;;  %v3278_v50 = vsel %vm2818_vm4, 4294967295, %v3277_v50  ;;  %v849_v9 = vrot.slane %v2751_v63, 2  ;;  %v247_v28 = vmul.f32 %v2527_v6, %v2789_v19  ;;  %v2830_v54 = vsel %vm640_vm11, %v646_v29, %v648_v8 }
  0x26   : > { %vm3279_vm15 = vcmask 1045504   ;;  %v652_v1 = vrot.slane %v2726_v5, 1  ;;  %v2848_v10 = vsel %vm640_vm11, %v648_v8, %v650_v52  ;;  %v654_v18 = vrot.slane %v2751_v63, 1 }
  0x27   : > { %2353 = vmatmul.mubr.msk.f32.gmra.mrb[6].mxu0 %vm468_vm1, %v864_v38  ;;  %2336 = vmatmul.mubr.msk.f32.vlgmr.msra.gmra.mrb[4].mxu1 %vm468_vm1, %v645_v36  ;;  %v2834_v20 = vsel %vm3279_vm15, %v845_v40, %v847_v46  ;;  %vm3280_vm14 = vmmov %vm3279_vm15  ;;  %v262_v61 = vadd.f32 %v2556_v13, %v247_v28  ;;  %vm2872_vm15 = vcmp.ge.s32.totalorder %v319_v30, 1  ;;  %v1552_v37 = vsel %vm2638_vm7, %v2670_v7, 0.0 }
  0x28   : > { %2355 = vmatprep.mubr.msk.f32.mxu0 %vm468_vm1, %v865_v22  ;;  %2338 = vmatprep.mubr.msk.f32.mxu1 %vm468_vm1, %v2798_v42  ;;  %v866_v6 = vsel %vm2808_vm0, %v2834_v20, 0.0  ;;  %v2844_v56 = vsel %vm3280_vm14, %v847_v46, %v849_v9  ;;  %v2861_v13 = vsel %vm640_vm11, %v650_v52, %v652_v1  ;;  %v2864_v27 = vsel %vm640_vm11, %v652_v1, %v654_v18  ;;  %v1886_v1 = vld [vmem:[%s3236_s1 + $0x40] sm:$0xff] }
  0x29   : > { %2362 = vmatpush3.msra.mxu1 %v2691_v33  ;;  %v867_v29 = vsel %vm2818_vm4, %v2844_v56, 0.0  ;;  %v270_v40 = vmax.f32 %v262_v61, 0.0  ;;  %vm3281_vm14 = vcmask 1040384   ;;  %vm2880_vm4 = vcmp.lt.s32.totalorder %v368_v32, 7 }
  0x2a   : > { %2389 = vmatprep.subr.mxu1 %v1379_v53  ;;  %v1039_v26 = vsel %vm2872_vm15, %v2652_v60, 0.0  ;;  %vm3287_vm0 = vcmask 1040384   ;;  %v1043_v61 = vsel %vm2612_vm3, %v2670_v7, 0.0  ;;  %v1554_v55 = vsel %vm2624_vm5, %v2751_v63, 0.0 }
  0x2b   : > { %2356 = vmatmul.mubr.msk.f32.gmra.mrb[8].mxu0 %vm468_vm1, %v866_v6  ;;  %2339 = vmatmul.mubr.msk.f32.gmra.mrb[6].mxu1 %vm468_vm1, %v2830_v54  ;;  %v293_v33 = vrot.slane %v270_v40, 7  ;;  %v1041_v6 = vsel %vm2630_vm6, %v2649_v59, 0.0  ;;  %v1880_v44 = vsel %vm2743_vm13, %v2801_v3, 0.0 }
  0x2c   : > { %2358 = vmatprep.mubr.msk.f32.mxu0 %vm468_vm1, %v867_v29  ;;  %2341 = vmatprep.mubr.msk.f32.mxu1 %vm468_vm1, %v2848_v10 }
  0x2d   : > { %v2868_v8 = vsel %vm3281_vm14, %v2728_v51, %v293_v33  ;;  %vm3286_vm14 = vcmask 1045504   ;;  %v2900_v32 = vsel %vm3287_vm0, %v293_v33, 0.0  ;;  %v1549_v33 = vsel %vm2872_vm15, %v2646_v58, 0.0 }
  0x2e   : > { %v851_v46 = vrot.slane %v2868_v8, 2  ;;  %v656_v51 = vrot.slane %v2868_v8, 1  ;;  %v1368_v28 = vrot.slane %v2900_v32, 2  ;;  %vm3288_vm0 = vmmov %vm3286_vm14  ;;  %v1219_v29 = vrot.slane %v2900_v32, 1 }
  0x2f   : > { %2342 = vmatmul.mubr.msk.f32.gmra.mrb[8].mxu1 %vm468_vm1, %v2861_v13  ;;  %v1046_v40 = vsel %vm2714_vm12, %v2868_v8, 0.0  ;;  %v1555_v7 = vsel %vm2706_vm10, %v2868_v8, 0.0  ;;  %vm3293_vm15 = vmmov %vm3288_vm0  ;;  %v1556_v47 = vsel %vm2714_vm12, %v2900_v32, 0.0  ;;  %v1879_v8 = vsel %vm2654_vm8, %v2785_v31, 0.0 }
  0x30   : > { %2344 = vmatprep.mubr.msk.f32.mxu1 %vm468_vm1, %v2864_v27  ;;  %v2891_v4 = vsel %vm3286_vm14, %v849_v9, %v851_v46  ;;  %v2894_v30 = vsel %vm640_vm11, %v654_v18, %v656_v51  ;;  %v1040_v9 = vsel %vm2605_vm2, %v2646_v58, 0.0  ;;  %v2916_v60 = vsel %vm3288_vm0, %v1368_v28, %v2544_v12 }
  0x31   : > { %v868_v52 = vsel %vm2880_vm4, %v2891_v4, 0.0  ;;  %v1042_v12 = vsel %vm2638_vm7, %v2662_v0, 0.0  ;;  %v1220_v18 = vsel %vm640_vm11, %v656_v51, %v1219_v29  ;;  %v1550_v51 = vsel %vm2605_vm2, %v2649_v59, 0.0 }
  0x32   : > { %2359 = vmatmul.mubr.msk.f32.gmra.mrb[10].mxu0 %vm468_vm1, %v868_v52  ;;  %v1372_v52 = vsel %vm2654_vm8, %v2766_v21, 0.0  ;;  %v1551_v58 = vsel %vm2630_vm6, %v2662_v0, 0.0  ;;  %vm3289_vm2 = vnez %v3272_v2  ;;  %v1553_v59 = vsel %vm2612_vm3, %v2726_v5, 0.0 }
  0x33   : > { %2345 = vmatmul.mubr.msk.f32.gmra.mrb[10].mxu1 %vm468_vm1, %v2894_v30  ;;  %2377 = vmatprep.mubr.msk.f32.mxu0 %vm468_vm1, %v645_v36  ;;  %v1727_v36 = vld [vmem:[%s3236_s1 + $0x38] sm:$0xff]  ;;  %v1374_v48 = vsel %vm3289_vm2, %v2801_v3, 0.0  ;;  %vm3290_vm6 = vnez %v3274_v14  ;;  %vm3291_vm3 = vnez %v3276_v41  ;;  %vm3292_vm7 = vnez %v3278_v50 }
  0x34   : > { %2363 = vmatprep.mubr.msk.f32.mxu1 %vm468_vm1, %v1039_v26  ;;  %v1371_v26 = vsel %vm2697_vm9, %v2721_v49, 0.0  ;;  %v1373_v49 = vsel %vm2743_vm13, %v2785_v31, 0.0  ;;  %v1375_v0 = vsel %vm3290_vm6, %v2834_v20, 0.0  ;;  %v1376_v39 = vsel %vm3291_vm3, %v2844_v56, 0.0 }
  0x35   : > { %v1369_v38 = vsel %vm3293_vm15, %v851_v46, %v1368_v28  ;;  %v1881_v62 = vsel %vm3289_vm2, %v2834_v20, 0.0  ;;  %v1882_v34 = vsel %vm3290_vm6, %v2844_v56, 0.0  ;;  %v1883_v57 = vsel %vm3291_vm3, %v2891_v4, 0.0 }
  0x36   : > { %2378 = vmatmul.mubr.msk.f32.vlgmr.msra.gmra.mrb[12].mxu0 %vm468_vm1, %v2798_v42  ;;  %v1378_v43 = vsel %vm2880_vm4, %v1369_v38, 0.0  ;;  %v1884_v2 = vsel %vm3292_vm7, %v1369_v38, 0.0  ;;  %v1885_v14 = vsel %vm2880_vm4, %v2916_v60, 0.0 }
  0x37   : > { %2364 = vmatmul.mubr.msk.f32.vlgmr.msra.gmra.mrb[12].mxu1 %vm468_vm1, %v1040_v9  ;;  %2380 = vmatprep.mubr.msk.f32.mxu0 %vm468_vm1, %v2830_v54 }
  0x38   : > { %2366 = vmatprep.mubr.msk.f32.mxu1 %vm468_vm1, %v1041_v6  ;;  %2404 = vmatpush3.msra.mxu0 %v2778_v23  ;;  %v1044_v23 = vsel %vm2624_vm5, %v2726_v5, 0.0  ;;  %v1377_v5 = vsel %vm3292_vm7, %v2891_v4, 0.0 }
  0x39   : > { %2390 = vmatpush3.msra.mxu1 %v1379_v53  ;;  %2431 = vmatprep.subr.mxu0 %v1886_v1  ;;  %v1045_v53 = vsel %vm2706_vm10, %v2751_v63, 0.0  ;;  %v1878_v63 = vsel %vm2697_vm9, %v2766_v21, 0.0  ;;  %v1728_v21 = vsel %vm640_vm11, %v1219_v29, %v2542_v11 }
  0x3a   : > { %2417 = vmatprep.subr.mxu1 %v1727_v36  ;;  %2381 = vmatmul.mubr.msk.f32.gmra.mrb[14].mxu0 %vm468_vm1, %v2848_v10 }
  0x3b   : > { %2367 = vmatmul.mubr.msk.f32.gmra.mrb[14].mxu1 %vm468_vm1, %v1042_v12  ;;  %2383 = vmatprep.mubr.msk.f32.mxu0 %vm468_vm1, %v2861_v13 }
  0x3c   : > { %2369 = vmatprep.mubr.msk.f32.mxu1 %vm468_vm1, %v1043_v61 }
  0x3e   : > { %2384 = vmatmul.mubr.msk.f32.gmra.mrb[16].mxu0 %vm468_vm1, %v2864_v27 }
  0x3f   : > { %2370 = vmatmul.mubr.msk.f32.gmra.mrb[16].mxu1 %vm468_vm1, %v1044_v23  ;;  %2386 = vmatprep.mubr.msk.f32.mxu0 %vm468_vm1, %v2894_v30 }
  0x40   : > { %2372 = vmatprep.mubr.msk.f32.mxu1 %vm468_vm1, %v1045_v53 }
  0x42   : > { %2387 = vmatmul.mubr.msk.f32.gmra.mrb[18].mxu0 %vm468_vm1, %v1220_v18 }
  0x43   : > { %2373 = vmatmul.mubr.msk.f32.gmra.mrb[18].mxu1 %vm468_vm1, %v1046_v40  ;;  %2405 = vmatprep.mubr.msk.f32.mxu0 %vm468_vm1, %v1549_v33 }
  0x44   : > { %2391 = vmatprep.mubr.msk.f32.mxu1 %vm468_vm1, %v1371_v26 }
  0x46   : > { %2406 = vmatmul.mubr.msk.f32.vlgmr.msra.gmra.mrb[20].mxu0 %vm468_vm1, %v1550_v51 }
  0x47   : > { %2392 = vmatmul.mubr.msk.f32.vlgmr.msra.gmra.mrb[20].mxu1 %vm468_vm1, %v1372_v52  ;;  %2408 = vmatprep.mubr.msk.f32.mxu0 %vm468_vm1, %v1551_v58 }
  0x48   : > { %2394 = vmatprep.mubr.msk.f32.mxu1 %vm468_vm1, %v1373_v49  ;;  %2432 = vmatpush3.msra.mxu0 %v1886_v1 }
  0x49   : > { %2418 = vmatpush3.msra.mxu1 %v1727_v36 }
  0x4a   : > { %2409 = vmatmul.mubr.msk.f32.gmra.mrb[22].mxu0 %vm468_vm1, %v1552_v37 }
  0x4b   : > { %2395 = vmatmul.mubr.msk.f32.gmra.mrb[22].mxu1 %vm468_vm1, %v1374_v48  ;;  %2411 = vmatprep.mubr.msk.f32.mxu0 %vm468_vm1, %v1553_v59 }
  0x4c   : > { %2397 = vmatprep.mubr.msk.f32.mxu1 %vm468_vm1, %v1375_v0 }
  0x4e   : > { %2412 = vmatmul.mubr.msk.f32.gmra.mrb[24].mxu0 %vm468_vm1, %v1554_v55 }
  0x4f   : > { %2398 = vmatmul.mubr.msk.f32.gmra.mrb[24].mxu1 %vm468_vm1, %v1376_v39  ;;  %2414 = vmatprep.mubr.msk.f32.mxu0 %vm468_vm1, %v1555_v7 }
  0x50   : > { %2400 = vmatprep.mubr.msk.f32.mxu1 %vm468_vm1, %v1377_v5 }
  0x52   : > { %2415 = vmatmul.mubr.msk.f32.gmra.mrb[26].mxu0 %vm468_vm1, %v1556_v47 }
  0x53   : > { %2401 = vmatmul.mubr.msk.f32.gmra.mrb[26].mxu1 %vm468_vm1, %v1378_v43  ;;  %2433 = vmatprep.mubr.msk.f32.mxu0 %vm468_vm1, %v1878_v63 }
  0x54   : > { %2419 = vmatprep.mubr.msk.f32.mxu1 %vm468_vm1, %v2798_v42 }
  0x56   : > { %2434 = vmatmul.mubr.msk.f32.vlgmr.msra.gmra.mrb[28].mxu0 %vm468_vm1, %v1879_v8 }
  0x57   : > { %2420 = vmatmul.mubr.msk.f32.vlgmr.msra.gmra.mrb[28].mxu1 %vm468_vm1, %v2830_v54  ;;  %2436 = vmatprep.mubr.msk.f32.mxu0 %vm468_vm1, %v1880_v44 }
  0x58   : > { %2422 = vmatprep.mubr.msk.f32.mxu1 %vm468_vm1, %v2848_v10 }
  0x5a   : > { %2437 = vmatmul.mubr.msk.f32.gmra.mrb[30].mxu0 %vm468_vm1, %v1881_v62 }
  0x5b   : > { %2423 = vmatmul.mubr.msk.f32.gmra.mrb[30].mxu1 %vm468_vm1, %v2861_v13  ;;  %2439 = vmatprep.mubr.msk.f32.mxu0 %vm468_vm1, %v1882_v34 }
  0x5c   : > { %2425 = vmatprep.mubr.msk.f32.mxu1 %vm468_vm1, %v2864_v27 }
  0x5e   : > { %2440 = vmatmul.mubr.msk.f32.gmra.mrb[32].mxu0 %vm468_vm1, %v1883_v57 }
  0x5f   : > { %2426 = vmatmul.mubr.msk.f32.gmra.mrb[32].mxu1 %vm468_vm1, %v2894_v30  ;;  %2442 = vmatprep.mubr.msk.f32.mxu0 %vm468_vm1, %v1884_v2 }
  0x60   : > { %2428 = vmatprep.mubr.msk.f32.mxu1 %vm468_vm1, %v1220_v18 }
  0x62   : > { %2443 = vmatmul.mubr.msk.f32.gmra.mrb[34].mxu0 %vm468_vm1, %v1885_v14 }
  0x63   : > { %2429 = vmatmul.mubr.msk.f32.gmra.mrb[34].mxu1 %vm468_vm1, %v1728_v21 }
  0xee   : > { %v2323_v31 = vpop.f32.mrb[0].mxu0 }
  0xef   : > { %608 = vrot.lane.b32.xlu1 %v2323_v31, %s2467_s11  ;;  %v559_v42 = vpop.f32.mrb[1].mxu0 }
  0xf0   : > { %606 = vrot.lane.b32.xlu0 %v559_v42, %s2467_s11  ;;  %v2329_v3 = vpop.f32.mrb[0].mxu1 }
  0xf1   : > { %v579_v41 = vpop.f32.mrb[1].mxu1 }
  0xf2   : > { %v2326_v50 = vpop.f32.mrb[2].mxu0 }
  0xf3   : > { %614 = vrot.lane.b32.xlu1 %v579_v41, %s2467_s11  ;;  %v569_v11 = vpop.f32.mrb[3].mxu0 }
  0xf4   : > { %616 = vrot.lane.b32.xlu0 %v2329_v3, %s2467_s11 }
  0xf6   : > { %v2351_v54 = vpop.f32.mrb[4].mxu0  ;;  %v2332_v20 = vpop.f32.mrb[2].mxu1 }
  0xf7   : > { %610 = vrot.lane.b32.xlu1 %v569_v11, %s2467_s11  ;;  %v960_v56 = vpop.f32.mrb[5].mxu0  ;;  %v589_v10 = vpop.f32.mrb[3].mxu1 }
  0xf8   : > { %612 = vrot.lane.b32.xlu0 %v2326_v50, %s2467_s11 }
  0xfa   : > { %v2354_v13 = vpop.f32.mrb[6].mxu0  ;;  %v2337_v27 = vpop.f32.mrb[4].mxu1 }
  0xfb   : > { %618 = vrot.lane.b32.xlu1 %v589_v10, %s2467_s11  ;;  %v970_v22 = vpop.f32.mrb[7].mxu0  ;;  %v740_v46 = vpop.f32.mrb[5].mxu1 }
  0xfc   : > { %620 = vrot.lane.b32.xlu0 %v2332_v20, %s2467_s11 }
  0xfe   : > { %v2357_v4 = vpop.f32.mrb[8].mxu0  ;;  %v2340_v30 = vpop.f32.mrb[6].mxu1 }
  0xff   : > { %1007 = vrot.lane.b32.xlu1 %v960_v56, %s2467_s11  ;;  %v980_v32 = vpop.f32.mrb[9].mxu0  ;;  %v750_v28 = vpop.f32.mrb[7].mxu1 }
 0x100   : > { %1009 = vrot.lane.b32.xlu0 %v2351_v54, %s2467_s11 }
 0x102   : > { %v2343_v9 = vpop.f32.mrb[8].mxu1 }
 0x103   : > { %787 = vrot.lane.b32.xlu1 %v740_v46, %s2467_s11  ;;  %v760_v60 = vpop.f32.mrb[9].mxu1 }
 0x104   : > { %789 = vrot.lane.b32.xlu0 %v2337_v27, %s2467_s11 }
 0x105   : > { %v2360_v6 = vpop.f32.mrb[10].mxu0 }
 0x106   : > { %v2346_v1 = vpop.f32.mrb[10].mxu1  ;;  %v990_v36 = vpop.f32.mrb[11].mxu0 }
 0x107   : > { %1011 = vrot.lane.b32.xlu1 %v970_v22, %s2467_s11  ;;  %v770_v12 = vpop.f32.mrb[11].mxu1 }
 0x108   : > { %1013 = vrot.lane.b32.xlu0 %v2354_v13, %s2467_s11 }
 0x109   : > { %v2379_v61 = vpop.f32.mrb[12].mxu0 }
 0x10a   : > { %v2365_v23 = vpop.f32.mrb[12].mxu1  ;;  %v1289_v29 = vpop.f32.mrb[13].mxu0 }
 0x10b   : > { %791 = vrot.lane.b32.xlu1 %v750_v28, %s2467_s11  ;;  %v1138_v53 = vpop.f32.mrb[13].mxu1 }
 0x10c   : > { %793 = vrot.lane.b32.xlu0 %v2340_v30, %s2467_s11 }
 0x10d   : > { %v2382_v18 = vpop.f32.mrb[14].mxu0 }
 0x10e   : > { %v2368_v40 = vpop.f32.mrb[14].mxu1  ;;  %v1299_v33 = vpop.f32.mrb[15].mxu0 }
 0x10f   : > { %1015 = vrot.lane.b32.xlu1 %v980_v32, %s2467_s11  ;;  %v1148_v26 = vpop.f32.mrb[15].mxu1  ;;  %v3140_v32 = vpop.permute.xlu0 %433 }
 0x110   : > { %1017 = vrot.lane.b32.xlu0 %v2357_v4, %s2467_s11 }
 0x111   : > { %v2385_v51 = vpop.f32.mrb[16].mxu0 }
 0x112   : > { %v2371_v52 = vpop.f32.mrb[16].mxu1  ;;  %v1309_v58 = vpop.f32.mrb[17].mxu0 }
 0x113   : > { %795 = vrot.lane.b32.xlu1 %v760_v60, %s2467_s11  ;;  %v1158_v49 = vpop.f32.mrb[17].mxu1 }
 0x114   : > { %797 = vrot.lane.b32.xlu0 %v2343_v9, %s2467_s11 }
 0x115   : > { %v2388_v37 = vpop.f32.mrb[18].mxu0 }
 0x116   : > { %v2374_v48 = vpop.f32.mrb[18].mxu1  ;;  %v1319_v59 = vpop.f32.mrb[19].mxu0 }
 0x117   : > { %1019 = vrot.lane.b32.xlu1 %v990_v36, %s2467_s11  ;;  %v1168_v0 = vpop.f32.mrb[19].mxu1 }
 0x118   : > { %1021 = vrot.lane.b32.xlu0 %v2360_v6, %s2467_s11 }
 0x119   : > { %v2407_v55 = vpop.f32.mrb[20].mxu0 }
 0x11a   : > { %v2393_v39 = vpop.f32.mrb[20].mxu1  ;;  %v1648_v7 = vpop.f32.mrb[21].mxu0 }
 0x11b   : > { %799 = vrot.lane.b32.xlu1 %v770_v12, %s2467_s11  ;;  %v1470_v5 = vpop.f32.mrb[21].mxu1 }
 0x11c   : > { %801 = vrot.lane.b32.xlu0 %v2346_v1, %s2467_s11 }
 0x11d   : > { %v2410_v38 = vpop.f32.mrb[22].mxu0 }
 0x11e   : > { %v2396_v47 = vpop.f32.mrb[22].mxu1  ;;  %v1658_v43 = vpop.f32.mrb[23].mxu0 }
 0x11f   : > { %1336 = vrot.lane.b32.xlu1 %v1289_v29, %s2467_s11  ;;  %v1480_v63 = vpop.f32.mrb[23].mxu1 }
 0x120   : > { %1338 = vrot.lane.b32.xlu0 %v2379_v61, %s2467_s11 }
 0x121   : > { %v2413_v8 = vpop.f32.mrb[24].mxu0 }
 0x122   : > { %v2399_v44 = vpop.f32.mrb[24].mxu1  ;;  %v1668_v62 = vpop.f32.mrb[25].mxu0 }
 0x123   : > { %1185 = vrot.lane.b32.xlu1 %v1138_v53, %s2467_s11  ;;  %v1490_v34 = vpop.f32.mrb[25].mxu1  ;;  %v436_v53 = vadd.f32 %v3140_v32, %v2562_v15  ;;  %v438_v15 = vadd.f32 %v3140_v32, %v2568_v17  ;;  %v440_v17 = vadd.f32 %v3140_v32, %v2584_v25  ;;  %v443_v25 = vadd.f32 %v3140_v32, %v2789_v19 }
 0x124   : > { %1187 = vrot.lane.b32.xlu0 %v2365_v23, %s2467_s11  ;;  %v437_v23 = vadd.f32 %v3140_v32, %v2565_v16 }
 0x125   : > { %v2416_v57 = vpop.f32.mrb[26].mxu0 }
 0x126   : > { %v2402_v2 = vpop.f32.mrb[26].mxu1  ;;  %v1678_v21 = vpop.f32.mrb[27].mxu0 }
 0x127   : > { %1340 = vrot.lane.b32.xlu1 %v1299_v33, %s2467_s11  ;;  %v1500_v14 = vpop.f32.mrb[27].mxu1 }
 0x128   : > { %1342 = vrot.lane.b32.xlu0 %v2382_v18, %s2467_s11 }
 0x129   : > { %v2435_v31 = vpop.f32.mrb[28].mxu0 }
 0x12a   : > { %v2421_v42 = vpop.f32.mrb[28].mxu1  ;;  %v1977_v3 = vpop.f32.mrb[29].mxu0 }
 0x12b   : > { %1189 = vrot.lane.b32.xlu1 %v1148_v26, %s2467_s11  ;;  %v1797_v41 = vpop.f32.mrb[29].mxu1 }
 0x12c   : > { %1191 = vrot.lane.b32.xlu0 %v2368_v40, %s2467_s11 }
 0x12d   : > { %v2438_v50 = vpop.f32.mrb[30].mxu0 }
 0x12e   : > { %v2424_v11 = vpop.f32.mrb[30].mxu1  ;;  %v1987_v54 = vpop.f32.mrb[31].mxu0 }
 0x12f   : > { %1344 = vrot.lane.b32.xlu1 %v1309_v58, %s2467_s11  ;;  %v1807_v20 = vpop.f32.mrb[31].mxu1 }
 0x130   : > { %1346 = vrot.lane.b32.xlu0 %v2385_v51, %s2467_s11 }
 0x131   : > { %v2441_v56 = vpop.f32.mrb[32].mxu0 }
 0x132   : > { %v2427_v10 = vpop.f32.mrb[32].mxu1  ;;  %v1997_v13 = vpop.f32.mrb[33].mxu0 }
 0x133   : > { %1193 = vrot.lane.b32.xlu1 %v1158_v49, %s2467_s11  ;;  %v1817_v27 = vpop.f32.mrb[33].mxu1 }
 0x134   : > { %1195 = vrot.lane.b32.xlu0 %v2371_v52, %s2467_s11 }
 0x135   : > { %v3119_v46 = vpop.f32.mrb[34].mxu0 }
 0x136   : > { %v2430_v22 = vpop.f32.mrb[34].mxu1  ;;  %v2007_v30 = vpop.f32.mrb[35].mxu0 }
 0x137   : > { %1348 = vrot.lane.b32.xlu1 %v1319_v59, %s2467_s11  ;;  %v1827_v4 = vpop.f32.mrb[35].mxu1  ;;  %v439_v59 = vadd.f32 %v3140_v32, %v2581_v24 }
 0x138   : > { %1350 = vrot.lane.b32.xlu0 %v2388_v37, %s2467_s11 }
 0x13b   : > { %1197 = vrot.lane.b32.xlu1 %v1168_v0, %s2467_s11 }
 0x13c   : > { %1199 = vrot.lane.b32.xlu0 %v2374_v48, %s2467_s11 }
 0x13f   : > { %1695 = vrot.lane.b32.xlu1 %v1648_v7, %s2467_s11 }
 0x140   : > { %1697 = vrot.lane.b32.xlu0 %v2407_v55, %s2467_s11 }
 0x143   : > { %1517 = vrot.lane.b32.xlu1 %v1470_v5, %s2467_s11 }
 0x144   : > { %1519 = vrot.lane.b32.xlu0 %v2393_v39, %s2467_s11 }
 0x147   : > { %1699 = vrot.lane.b32.xlu1 %v1658_v43, %s2467_s11 }
 0x148   : > { %1701 = vrot.lane.b32.xlu0 %v2410_v38, %s2467_s11 }
 0x14b   : > { %1521 = vrot.lane.b32.xlu1 %v1480_v63, %s2467_s11 }
 0x14c   : > { %1523 = vrot.lane.b32.xlu0 %v2396_v47, %s2467_s11 }
 0x14f   : > { %1703 = vrot.lane.b32.xlu1 %v1668_v62, %s2467_s11 }
 0x150   : > { %1705 = vrot.lane.b32.xlu0 %v2413_v8, %s2467_s11  ;;  %v441_v8 = vadd.f32 %v3140_v32, %v2600_v35 }
 0x153   : > { %1525 = vrot.lane.b32.xlu1 %v1490_v34, %s2467_s11 }
 0x154   : > { %1527 = vrot.lane.b32.xlu0 %v2399_v44, %s2467_s11 }
 0x157   : > { %1707 = vrot.lane.b32.xlu1 %v1678_v21, %s2467_s11 }
 0x158   : > { %1709 = vrot.lane.b32.xlu0 %v2416_v57, %s2467_s11 }
 0x15b   : > { %1529 = vrot.lane.b32.xlu1 %v1500_v14, %s2467_s11 }
 0x15c   : > { %1531 = vrot.lane.b32.xlu0 %v2402_v2, %s2467_s11 }
 0x15f   : > { %2024 = vrot.lane.b32.xlu1 %v1977_v3, %s2467_s11  ;;  %v442_v3 = vadd.f32 %v3140_v32, %v2620_v45 }
 0x160   : > { %2026 = vrot.lane.b32.xlu0 %v2435_v31, %s2467_s11 }
 0x161   : > { %v609_v28 = vpop.permute.xlu1 %608 }
 0x162   : > { %v607_v9 = vpop.permute.xlu0 %606  ;;  %v631_v33 = vadd.f32 %v609_v28, %v437_v23 }
 0x163   : > { %1844 = vrot.lane.b32.xlu1 %v1797_v41, %s2467_s11  ;;  %v630_v40 = vadd.f32 %v607_v9, %v436_v53 }
 0x164   : > { %1846 = vrot.lane.b32.xlu0 %v2421_v42, %s2467_s11 }
 0x165   : > { %v615_v60 = vpop.permute.xlu1 %614 }
 0x166   : > { %v617_v6 = vpop.permute.xlu0 %616  ;;  %v634_v44 = vadd.f32 %v615_v60, %v440_v17 }
 0x167   : > { %2028 = vrot.lane.b32.xlu1 %v1987_v54, %s2467_s11  ;;  %v635_v62 = vadd.f32 %v617_v6, %v441_v8 }
 0x168   : > { %2030 = vrot.lane.b32.xlu0 %v2438_v50, %s2467_s11 }
 0x169   : > { %v611_v1 = vpop.permute.xlu1 %610 }
 0x16a   : > { %v613_v36 = vpop.permute.xlu0 %612  ;;  %v632_v0 = vadd.f32 %v611_v1, %v438_v15 }
 0x16b   : > { %1848 = vrot.lane.b32.xlu1 %v1807_v20, %s2467_s11  ;;  %v633_v55 = vadd.f32 %v613_v36, %v439_v59 }
 0x16c   : > { %1850 = vrot.lane.b32.xlu0 %v2424_v11, %s2467_s11 }
 0x16d   : > { %v619_v12 = vpop.permute.xlu1 %618 }
 0x16e   : > { %v621_v61 = vpop.permute.xlu0 %620  ;;  %v636_v50 = vadd.f32 %v619_v12, %v442_v3 }
 0x16f   : > { %2032 = vrot.lane.b32.xlu1 %v1997_v13, %s2467_s11  ;;  %v637_v35 = vadd.f32 %v621_v61, %v443_v25 }
 0x170   : > { %2034 = vrot.lane.b32.xlu0 %v2441_v56, %s2467_s11 }
 0x171   : > { %v1008_v29 = vpop.permute.xlu1 %1007 }
 0x172   : > { %v1010_v18 = vpop.permute.xlu0 %1009 }
 0x173   : > { %1852 = vrot.lane.b32.xlu1 %v1817_v27, %s2467_s11 }
 0x174   : > { %1854 = vrot.lane.b32.xlu0 %v2427_v10, %s2467_s11 }
 0x175   : > { %v788_v26 = vpop.permute.xlu1 %787 }
 0x176   : > { %v811_v51 = vadd.f32 %v788_v26, %v630_v40  ;;  %v790_v52 = vpop.permute.xlu0 %789 }
 0x177   : > { %v812_v58 = vadd.f32 %v790_v52, %v631_v33  ;;  %1856 = vrot.lane.b32.xlu1 %v1827_v4, %s2467_s11 }
 0x178   : > { %1858 = vrot.lane.b32.xlu0 %v2430_v22, %s2467_s11  ;;  %v3160_v16 = vadd.f32 %v1008_v29, %v811_v51 }
 0x179   : > { %v1012_v49 = vpop.permute.xlu1 %1011  ;;  %v3162_v37 = vadd.f32 %v1010_v18, %v812_v58 }
 0x17a   : > { %v1014_v48 = vpop.permute.xlu0 %1013 }
 0x17b   : > { %2036 = vrot.lane.b32.xlu1 %v2007_v30, %s2467_s11 }
 0x17c   : > { %2038 = vrot.lane.b32.xlu0 %v3119_v46, %s2467_s11 }
 0x17d   : > { %v792_v39 = vpop.permute.xlu1 %791 }
 0x17e   : > { %v813_v7 = vadd.f32 %v792_v39, %v632_v0  ;;  %v794_v5 = vpop.permute.xlu0 %793 }
 0x17f   : > { %v814_v38 = vadd.f32 %v794_v5, %v633_v55 }
 0x180   : > { %v3171_v47 = vadd.f32 %v1012_v49, %v813_v7 }
 0x181   : > { %v1016_v43 = vpop.permute.xlu1 %1015  ;;  %v3173_v63 = vadd.f32 %v1014_v48, %v814_v38 }
 0x182   : > { %v1018_v24 = vpop.permute.xlu0 %1017 }
 0x185   : > { %v796_v34 = vpop.permute.xlu1 %795 }
 0x186   : > { %v815_v57 = vadd.f32 %v796_v34, %v634_v44  ;;  %v798_v2 = vpop.permute.xlu0 %797 }
 0x187   : > { %v816_v21 = vadd.f32 %v798_v2, %v635_v62 }
 0x188   : > { %v3179_v14 = vadd.f32 %v1016_v43, %v815_v57 }
 0x189   : > { %v1020_v31 = vpop.permute.xlu1 %1019  ;;  %v3181_v42 = vadd.f32 %v1018_v24, %v816_v21 }
 0x18a   : > { %v1022_v41 = vpop.permute.xlu0 %1021 }
 0x18d   : > { %v800_v11 = vpop.permute.xlu1 %799 }
 0x18e   : > { %v817_v54 = vadd.f32 %v800_v11, %v636_v50  ;;  %v802_v20 = vpop.permute.xlu0 %801 }
 0x18f   : > { %v818_v56 = vadd.f32 %v802_v20, %v637_v35 }
 0x190   : > { %v3187_v10 = vadd.f32 %v1020_v31, %v817_v54 }
 0x191   : > { %v1337_v13 = vpop.permute.xlu1 %1336  ;;  %v3189_v27 = vadd.f32 %v1022_v41, %v818_v56 }
 0x192   : > { %v1339_v22 = vpop.permute.xlu0 %1338 }
 0x195   : > { %v1186_v46 = vpop.permute.xlu1 %1185 }
 0x196   : > { %v1188_v4 = vpop.permute.xlu0 %1187  ;;  %v1209_v59 = vadd.f32 %v1186_v46, %v3160_v16 }
 0x197   : > { %v1210_v55 = vadd.f32 %v1188_v4, %v3162_v37 }
 0x198   : > { %v1360_v7 = vadd.f32 %v1337_v13, %v1209_v59 }
 0x199   : > { %v1341_v30 = vpop.permute.xlu1 %1340  ;;  %v1361_v38 = vadd.f32 %v1339_v22, %v1210_v55 }
 0x19a   : > { %v1343_v45 = vpop.permute.xlu0 %1342 }
 0x19d   : > { %v1190_v28 = vpop.permute.xlu1 %1189 }
 0x19e   : > { %v1192_v9 = vpop.permute.xlu0 %1191  ;;  %v1211_v8 = vadd.f32 %v1190_v28, %v3171_v47 }
 0x19f   : > { %v1212_v62 = vadd.f32 %v1192_v9, %v3173_v63 }
 0x1a0   : > { %v1362_v16 = vadd.f32 %v1341_v30, %v1211_v8 }
 0x1a1   : > { %v1345_v60 = vpop.permute.xlu1 %1344  ;;  %v1363_v3 = vadd.f32 %v1343_v45, %v1212_v62 }
 0x1a2   : > { %v1347_v19 = vpop.permute.xlu0 %1346 }
 0x1a5   : > { %v1194_v32 = vpop.permute.xlu1 %1193 }
 0x1a6   : > { %v1196_v6 = vpop.permute.xlu0 %1195  ;;  %v1213_v54 = vadd.f32 %v1194_v32, %v3179_v14 }
 0x1a7   : > { %v1214_v47 = vadd.f32 %v1196_v6, %v3181_v42 }
 0x1a8   : > { %v1364_v22 = vadd.f32 %v1345_v60, %v1213_v54 }
 0x1a9   : > { %v3191_v1 = vpop.permute.xlu1 %1348  ;;  %v1365_v30 = vadd.f32 %v1347_v19, %v1214_v47 }
 0x1aa   : > { %v3193_v36 = vpop.permute.xlu0 %1350 }
 0x1ad   : > { %v1198_v12 = vpop.permute.xlu1 %1197 }
 0x1ae   : > { %v1200_v61 = vpop.permute.xlu0 %1199  ;;  %v1215_v28 = vadd.f32 %v1198_v12, %v3187_v10 }
 0x1af   : > { %v1216_v32 = vadd.f32 %v1200_v61, %v3189_v27 }
 0x1b0   : > { %v1366_v60 = vadd.f32 %v3191_v1, %v1215_v28 }
 0x1b1   : > { %v1696_v23 = vpop.permute.xlu1 %1695  ;;  %v1367_v19 = vadd.f32 %v3193_v36, %v1216_v32 }
 0x1b2   : > { %v1698_v29 = vpop.permute.xlu0 %1697 }
 0x1b5   : > { %v1518_v53 = vpop.permute.xlu1 %1517 }
 0x1b6   : > { %v1520_v18 = vpop.permute.xlu0 %1519  ;;  %v1541_v43 = vadd.f32 %v1518_v53, %v1360_v7 }
 0x1b7   : > { %v1542_v17 = vadd.f32 %v1520_v18, %v1361_v38 }
 0x1b8   : > { %v1719_v34 = vadd.f32 %v1696_v23, %v1541_v43 }
 0x1b9   : > { %v1700_v40 = vpop.permute.xlu1 %1699  ;;  %v1720_v2 = vadd.f32 %v1698_v29, %v1542_v17 }
 0x1ba   : > { %v1702_v33 = vpop.permute.xlu0 %1701 }
 0x1bd   : > { %v1522_v26 = vpop.permute.xlu1 %1521 }
 0x1be   : > { %v1524_v51 = vpop.permute.xlu0 %1523  ;;  %v1543_v41 = vadd.f32 %v1522_v26, %v1362_v16 }
 0x1bf   : > { %v1544_v50 = vadd.f32 %v1524_v51, %v1363_v3 }
 0x1c0   : > { %v1721_v63 = vadd.f32 %v1700_v40, %v1543_v41 }
 0x1c1   : > { %v1704_v52 = vpop.permute.xlu1 %1703  ;;  %v1722_v13 = vadd.f32 %v1702_v33, %v1544_v50 }
 0x1c2   : > { %v1706_v58 = vpop.permute.xlu0 %1705 }
 0x1c5   : > { %v1526_v49 = vpop.permute.xlu1 %1525 }
 0x1c6   : > { %v1528_v15 = vpop.permute.xlu0 %1527  ;;  %v1545_v9 = vadd.f32 %v1526_v49, %v1364_v22 }
 0x1c7   : > { %v1546_v23 = vadd.f32 %v1528_v15, %v1365_v30 }
 0x1c8   : > { %v1723_v6 = vadd.f32 %v1704_v52, %v1545_v9 }
 0x1c9   : > { %v3195_v48 = vpop.permute.xlu1 %1707  ;;  %v1724_v40 = vadd.f32 %v1706_v58, %v1546_v23 }
 0x1ca   : > { %v3198_v0 = vpop.permute.xlu0 %1709 }
 0x1cd   : > { %v1530_v39 = vpop.permute.xlu1 %1529 }
 0x1ce   : > { %v1532_v5 = vpop.permute.xlu0 %1531  ;;  %v1547_v10 = vadd.f32 %v1530_v39, %v1366_v60 }
 0x1cf   : > { %v1548_v26 = vadd.f32 %v1532_v5, %v1367_v19 }
 0x1d0   : > { %v1725_v15 = vadd.f32 %v3195_v48, %v1547_v10 }
 0x1d1   : > { %v2025_v24 = vpop.permute.xlu1 %2024  ;;  %v1726_v1 = vadd.f32 %v3198_v0, %v1548_v26 }
 0x1d2   : > { %v2027_v44 = vpop.permute.xlu0 %2026 }
 0x1d5   : > { %v1845_v57 = vpop.permute.xlu1 %1844 }
 0x1d6   : > { %v1868_v21 = vadd.f32 %v1845_v57, %v1719_v34  ;;  %v1847_v31 = vpop.permute.xlu0 %1846 }
 0x1d7   : > { %v1869_v37 = vadd.f32 %v1847_v31, %v1720_v2 }
 0x1d8   : > { %v2048_v25 = vadd.f32 %v2025_v24, %v1868_v21 }
 0x1d9   : > { %v2049_v35 = vadd.f32 %v2027_v44, %v1869_v37  ;;  %v2029_v11 = vpop.permute.xlu1 %2028 }
 0x1da   : > { %v2031_v20 = vpop.permute.xlu0 %2030  ;;  %2064 = vrot.lane.b32.xlu1 %v2048_v25, %s2468_s26 }
 0x1db   : > { %2066 = vrot.lane.b32.xlu0 %v2049_v35, %s2468_s26 }
 0x1dd   : > { %v1849_v56 = vpop.permute.xlu1 %1848 }
 0x1de   : > { %v1870_v46 = vadd.f32 %v1849_v56, %v1721_v63  ;;  %v1851_v4 = vpop.permute.xlu0 %1850 }
 0x1df   : > { %v1871_v45 = vadd.f32 %v1851_v4, %v1722_v13 }
 0x1e0   : > { %v2050_v14 = vadd.f32 %v2029_v11, %v1870_v46 }
 0x1e1   : > { %v2051_v29 = vadd.f32 %v2031_v20, %v1871_v45  ;;  %v2033_v53 = vpop.permute.xlu1 %2032 }
 0x1e2   : > { %v2035_v42 = vpop.permute.xlu0 %2034  ;;  %2068 = vrot.lane.b32.xlu1 %v2050_v14, %s2468_s26 }
 0x1e3   : > { %2070 = vrot.lane.b32.xlu0 %v2051_v29, %s2468_s26 }
 0x1e5   : > { %v1853_v18 = vpop.permute.xlu1 %1852 }
 0x1e6   : > { %v1872_v12 = vadd.f32 %v1853_v18, %v1723_v6  ;;  %v1855_v33 = vpop.permute.xlu0 %1854 }
 0x1e7   : > { %v1873_v27 = vadd.f32 %v1855_v33, %v1724_v40 }
 0x1e8   : > { %v2052_v61 = vadd.f32 %v2033_v53, %v1872_v12 }
 0x1e9   : > { %v2053_v51 = vadd.f32 %v2035_v42, %v1873_v27  ;;  %v1857_v49 = vpop.permute.xlu1 %1856 }
 0x1ea   : > { %v1859_v59 = vpop.permute.xlu0 %1858  ;;  %2072 = vrot.lane.b32.xlu1 %v2052_v61, %s2468_s26  ;;  %v1874_v36 = vadd.f32 %v1857_v49, %v1725_v15 }
 0x1eb   : > { %2074 = vrot.lane.b32.xlu0 %v2053_v51, %s2468_s26  ;;  %v1875_v52 = vadd.f32 %v1859_v59, %v1726_v1 }
 0x1ed   : > { %v2037_v58 = vpop.permute.xlu1 %2036 }
 0x1ee   : > { %v2054_v55 = vadd.f32 %v2037_v58, %v1874_v36  ;;  %v2039_v39 = vpop.permute.xlu0 %2038 }
 0x1ef   : > { %v2055_v7 = vadd.f32 %v2039_v39, %v1875_v52 }
 0x1f0   : > { %2076 = vrot.lane.b32.xlu1 %v2054_v55, %s2468_s26 }
 0x1f1   : > { %2078 = vrot.lane.b32.xlu0 %v2055_v7, %s2468_s26 }
 0x24c   : > { %v2065_v48 = vpop.permute.xlu1 %2064 }
 0x24d   : > { %2088 = vst.msk [vmem:[%s224_s30] sm:$0xff] %vm468_vm1, %v2065_v48  ;;  %v2067_v0 = vpop.permute.xlu0 %2066 }
 0x24e   : > { %2089 = vst.msk [vmem:[%s224_s30 + $0x8] sm:$0xff] %vm468_vm1, %v2067_v0 }
 0x254   : > { %v2069_v5 = vpop.permute.xlu1 %2068 }
 0x255   : > { %2090 = vst.msk [vmem:[%s224_s30 + $0x10] sm:$0xff] %vm468_vm1, %v2069_v5  ;;  %v2071_v38 = vpop.permute.xlu0 %2070 }
 0x256   : > { %2091 = vst.msk [vmem:[%s224_s30 + $0x18] sm:$0xff] %vm468_vm1, %v2071_v38 }
 0x25c   : > { %v2073_v43 = vpop.permute.xlu1 %2072 }
 0x25d   : > { %2092 = vst.msk [vmem:[%s224_s30 + $0x20] sm:$0xff] %vm468_vm1, %v2073_v43  ;;  %v2075_v17 = vpop.permute.xlu0 %2074 }
 0x25e   : > { %2093 = vst.msk [vmem:[%s224_s30 + $0x28] sm:$0xff] %vm468_vm1, %v2075_v17 }
 0x262   : > { %v2077_v24 = vpop.permute.xlu1 %2076 }
 0x263   : > { %2094 = vst.msk [vmem:[%s224_s30 + $0x30] sm:$0xff] %vm468_vm1, %v2077_v24  ;;  %v2079_v8 = vpop.permute.xlu0 %2078 }
 0x264   : > { %2095 = vst.msk [vmem:[%s224_s30 + $0x38] sm:$0xff] %vm468_vm1, %v2079_v8 }
 0x265 PF: > { %s15_s18 = sadd.s32 1, %s2464_s18  }
 0x266   : > { %p12_p4 = scmp.ge.s32.totalorder %s15_s18, 4  }
 0x268   :  { %14 = sbr.rel (!%p12_p4) target bundleno = 1 (0x1), region = 70 }

</bundles_post_ra>
